<compile_context>
chip_gen: v6e
topology: v6e:2x2x1
jax: 0.10.0
libtpu: 0.0.40
codegen_flags: <defaults>
</compile_context>

<pallas_src>
import functools

import jax
import jax.numpy as jnp
from jax.experimental import pallas as pl
from jax.experimental.pallas import tpu as pltpu


# ----------------------------------------------------------------------------
# Pallas kernel: grid = (batch blocks, point chunks).
#   per chunk : conv1..3 (+folded BN) + relu  ->  chunk max  ->  running max
#   last chunk: fc1..2 (+folded BN) + relu    ->  fc3 matmul -> out
#   (fc3 bias + identity are added outside the kernel)
# ----------------------------------------------------------------------------
def stnkd_kernel(x_ref,
                 w1_ref, b1_ref,
                 w2_ref, b2_ref,
                 w3_ref, b3_ref,
                 w4_ref, b4_ref,
                 w5_ref, b5_ref,
                 w6_ref,
                 out_ref,
                 gmax_ref):
    nc = pl.program_id(1)
    bb, cn, k = x_ref.shape

    def mm(a, w_ref):
        # bf16 x bf16 on the MXU, f32 accumulation.
        return jnp.dot(a, w_ref[...], preferred_element_type=jnp.float32)

    def relu_bf16(acc, b_ref):
        # bias + ReLU in f32, downcast fused into the epilogue.
        return jnp.maximum(acc + b_ref[...], 0.0).astype(jnp.bfloat16)

    # point-wise "conv" stack (1x1 conv == matmul over the channel axis)
    x = x_ref[...].reshape(bb * cn, k)                       # bf16 (pre-cast)
    h = relu_bf16(mm(x, w1_ref), b1_ref)                     # (bb*cn, 64)
    h = relu_bf16(mm(h, w2_ref), b2_ref)                     # (bb*cn, 128)
    h = relu_bf16(mm(h, w3_ref), b3_ref)                     # (bb*cn, hidden_1)

    # per-chunk max over points (torch.max(x, 2)), accumulated across chunks
    cmax = jnp.max(h.reshape(bb, cn, -1), axis=1)            # (bb, hidden_1) bf16

    @pl.when(nc == 0)
    def _():
        gmax_ref[...] = jnp.full_like(gmax_ref, -jnp.inf)

    gmax_ref[...] = jnp.maximum(gmax_ref[...], cmax.astype(jnp.float32))

    @pl.when(nc == pl.num_programs(1) - 1)
    def _():
        g = gmax_ref[...].astype(jnp.bfloat16)               # (bb, hidden_1)
        g = relu_bf16(mm(g, w4_ref), b4_ref)                 # (bb, hidden_2)
        g = relu_bf16(mm(g, w5_ref), b5_ref)                 # (bb, hidden_3)
        out_ref[...] = mm(g, w6_ref)                         # (bb, k*k) f32


def _num_tensorcores():
    """Best-effort TensorCores per device (1 on v5e/v6e, 2 on v7x)."""
    try:
        dev = jax.devices()[0]
        for attr in ("num_cores", "core_count", "num_tensorcores"):
            v = getattr(dev, attr, None)
            if isinstance(v, int) and 1 <= v <= 8:
                return v
    except Exception:
        pass
    return 1


def stnkd_forward(x_bkn, params, *, k, num_batch_blocks=None, block_n=None):
    """x_bkn: (B, k, N) float32 (PyTorch NCL layout).  Returns (B, k, k) f32."""
    B, k_in, N = x_bkn.shape
    assert k_in == k
    (w1, b1, w2, b2, w3, b3, w4, b4, w5, b5, w6, b6) = params
    hidden_1 = w3.shape[1]

    # --- grid sizing -------------------------------------------------------
    if num_batch_blocks is None:
        num_batch_blocks = _num_tensorcores()   # 1 step/TC: 1 (v5e/v6e), 2 (v7x)
    unit = 8 * num_batch_blocks                 # keep sublane-aligned batch blocks
    B_pad = -(-B // unit) * unit
    Bb = B_pad // num_batch_blocks

    if block_n is None:
        block_n = N if N <= 512 else 512
    if N % block_n != 0:
        block_n = N                             # fall back to a single chunk
    assert N % block_n == 0 and block_n % 8 == 0, "N / point chunk must be 8-aligned"
    n_chunks = N // block_n

    # --- operand prep ------------------------------------------------------
    # MXU operands in bf16; biases (epilogue) stay f32.
    w1b, w2b, w3b, w4b, w5b, w6b = (
        w.astype(jnp.bfloat16) for w in (w1, w2, w3, w4, w5, w6))

    # (B, k, N) -> (B_pad, N, k) and pre-cast the activation slab to bf16
    # (halves HBM->VMEM DMA bytes for the dominant input).
    x_bnk = jnp.transpose(x_bkn, (0, 2, 1)).astype(jnp.bfloat16)
    if B_pad != B:
        x_bnk = jnp.pad(x_bnk, ((0, B_pad - B), (0, 0), (0, 0)))

    def const_spec(a):
        nd = a.ndim
        # Constant index_map => nothing to pipeline; single buffer saves VMEM.
        return pl.BlockSpec(a.shape, lambda b, n: (0,) * nd,
                            pipeline_mode=pl.Buffered(1))

    out_flat = pl.pallas_call(
        stnkd_kernel,
        out_shape=jax.ShapeDtypeStruct((B_pad, k * k), jnp.float32),
        grid_spec=pltpu.PrefetchScalarGridSpec(
            num_scalar_prefetch=0,
            grid=(B_pad // Bb, n_chunks),
            in_specs=[
                pl.BlockSpec((Bb, block_n, k), lambda b, n: (b, n, 0)),  # x chunk
                const_spec(w1b), const_spec(b1),
                const_spec(w2b), const_spec(b2),
                const_spec(w3b), const_spec(b3),
                const_spec(w4b), const_spec(b4),
                const_spec(w5b), const_spec(b5),
                const_spec(w6b),
            ],
            out_specs=pl.BlockSpec((Bb, k * k), lambda b, n: (b, 0)),
            scratch_shapes=[pltpu.VMEM((Bb, hidden_1), jnp.float32)],
        ),
        compiler_params=pltpu.CompilerParams(
            dimension_semantics=("parallel", "arbitrary")),
    )(x_bnk,
      w1b, b1, w2b, b2, w3b, b3,
      w4b, b4, w5b, b5, w6b)

    # fc3 bias + flattened identity added outside the kernel (fused by XLA).
    iden = jnp.eye(k, dtype=jnp.float32).reshape(1, k * k)
    out = out_flat[:B] + b6 + iden
    return out.reshape(B, k, k)


# ----------------------------------------------------------------------------
# Deterministic parameter construction + BN folding (plain JAX glue).
# ----------------------------------------------------------------------------
def _fold_bn(w, b, gamma, beta, mean, var, eps=1e-5):
    """Fold inference-mode BatchNorm1d into a preceding (Cin, Cout) matmul."""
    scale = gamma / jnp.sqrt(var + eps)          # (Cout,)
    w_f = w * scale[None, :]                     # (Cin, Cout)
    b_f = (b - mean) * scale + beta              # (Cout,)
    return w_f, b_f[None, :]                     # bias kept 2D: (1, Cout)


def make_params(key, k, hidden_1, hidden_2, hidden_3):
    dims = [(k, 64), (64, 128), (128, hidden_1),
            (hidden_1, hidden_2), (hidden_2, hidden_3), (hidden_3, k * k)]
    keys = jax.random.split(key, 4 * len(dims))
    params = []
    ki = 0
    for li, (cin, cout) in enumerate(dims):
        w = jax.random.normal(keys[ki], (cin, cout), jnp.float32) * 0.05; ki += 1
        b = jax.random.normal(keys[ki], (cout,), jnp.float32) * 0.05; ki += 1
        if li < 5:  # layers followed by a BatchNorm (bn1..bn5)
            gamma = 1.0 + 0.1 * jax.random.normal(keys[ki], (cout,), jnp.float32); ki += 1
            bmv = jax.random.normal(keys[ki], (3, cout), jnp.float32); ki += 1
            beta = 0.05 * bmv[0]
            mean = 0.05 * bmv[1]
            var = 0.5 + 0.25 * jax.nn.sigmoid(bmv[2])
            w, b2d = _fold_bn(w, b, gamma, beta, mean, var)
            params += [w, b2d]
        else:       # fc3: no BN
            ki += 2
            params += [w, b[None, :]]
    return tuple(params)


def reference_forward(x_bkn, params, *, k):
    """Pure-JAX reference (same bf16 matmul operands, f32 accumulation)."""
    (w1, b1, w2, b2, w3, b3, w4, b4, w5, b5, w6, b6) = params
    bf = jnp.bfloat16

    def mm(a, w):
        return jnp.dot(a.astype(bf), w.astype(bf),
                       preferred_element_type=jnp.float32)

    x = jnp.transpose(x_bkn, (0, 2, 1))                    # (B, N, k)
    h = jnp.maximum(mm(x, w1) + b1, 0.0)
    h = jnp.maximum(mm(h, w2) + b2, 0.0)
    h = jnp.maximum(mm(h, w3) + b3, 0.0)
    g = jnp.max(h, axis=1)                                 # (B, hidden_1)
    g = jnp.maximum(mm(g, w4) + b4, 0.0)
    g = jnp.maximum(mm(g, w5) + b5, 0.0)
    g = mm(g, w6) + b6 + jnp.eye(k, dtype=jnp.float32).reshape(1, k * k)
    return g.reshape(-1, k, k)


if __name__ == "__main__":
    # Small, forward-consistent shapes:
    #   k=16 channels, N=64 points (2 chunks of 32), B=16, hidden 256/128/64.
    B, N = 16, 64
    k, hidden_1, hidden_2, hidden_3 = 16, 256, 128, 64

    key = jax.random.PRNGKey(0)
    kx, kp = jax.random.split(key)

    # PyTorch input layout is (B, k, N).
    x_bkn = jax.random.normal(kx, (B, k, N), jnp.float32)
    params = make_params(kp, k, hidden_1, hidden_2, hidden_3)

    fwd = jax.jit(functools.partial(stnkd_forward, k=k, block_n=32))
    out = fwd(x_bkn, params)
    jax.block_until_ready(out)

    ref = reference_forward(x_bkn, params, k=k)
    assert out.shape == (B, k, k)
    # bf16 MXU operands / intermediates -> loosened tolerance vs the reference.
    assert jnp.allclose(out, ref, atol=1e-2, rtol=1e-2), "mismatch vs reference"

    print("KERNEL_OK")
</pallas_src>

<mosaic_0001>
module attributes {stable_mosaic.version = 11 : i64} {
  func.func @stnkd_kernel(%arg0: i32, %arg1: i32, %arg2: memref<16x32x16xbf16, #tpu.memory_space<vmem>>, %arg3: memref<16x64xbf16, #tpu.memory_space<vmem>>, %arg4: memref<1x64xf32, #tpu.memory_space<vmem>>, %arg5: memref<64x128xbf16, #tpu.memory_space<vmem>>, %arg6: memref<1x128xf32, #tpu.memory_space<vmem>>, %arg7: memref<128x256xbf16, #tpu.memory_space<vmem>>, %arg8: memref<1x256xf32, #tpu.memory_space<vmem>>, %arg9: memref<256x128xbf16, #tpu.memory_space<vmem>>, %arg10: memref<1x128xf32, #tpu.memory_space<vmem>>, %arg11: memref<128x64xbf16, #tpu.memory_space<vmem>>, %arg12: memref<1x64xf32, #tpu.memory_space<vmem>>, %arg13: memref<64x256xbf16, #tpu.memory_space<vmem>>, %arg14: memref<16x256xf32, #tpu.memory_space<vmem>>, %arg15: memref<16x256xf32, #tpu.memory_space<vmem>>) attributes {dimension_semantics = [#tpu.dimension_semantics<parallel>, #tpu.dimension_semantics<arbitrary>], iteration_bounds = array<i64: 1, 2>, scalar_prefetch = 0 : i64, scratch_operands = 1 : i64, tpu.core_type = #tpu.core_type<tc>, window_params = [{transform_indices = @transform_0, window_bounds = array<i64: 16, 32, 16>}, {pipeline_mode = #tpu.pipeline_mode<synchronous>, transform_indices = @transform_1, window_bounds = array<i64: 16, 64>}, {pipeline_mode = #tpu.pipeline_mode<synchronous>, transform_indices = @transform_2, window_bounds = array<i64: 1, 64>}, {pipeline_mode = #tpu.pipeline_mode<synchronous>, transform_indices = @transform_3, window_bounds = array<i64: 64, 128>}, {pipeline_mode = #tpu.pipeline_mode<synchronous>, transform_indices = @transform_4, window_bounds = array<i64: 1, 128>}, {pipeline_mode = #tpu.pipeline_mode<synchronous>, transform_indices = @transform_5, window_bounds = array<i64: 128, 256>}, {pipeline_mode = #tpu.pipeline_mode<synchronous>, transform_indices = @transform_6, window_bounds = array<i64: 1, 256>}, {pipeline_mode = #tpu.pipeline_mode<synchronous>, transform_indices = @transform_7, window_bounds = array<i64: 256, 128>}, {pipeline_mode = #tpu.pipeline_mode<synchronous>, transform_indices = @transform_8, window_bounds = array<i64: 1, 128>}, {pipeline_mode = #tpu.pipeline_mode<synchronous>, transform_indices = @transform_9, window_bounds = array<i64: 128, 64>}, {pipeline_mode = #tpu.pipeline_mode<synchronous>, transform_indices = @transform_10, window_bounds = array<i64: 1, 64>}, {pipeline_mode = #tpu.pipeline_mode<synchronous>, transform_indices = @transform_11, window_bounds = array<i64: 64, 256>}, {transform_indices = @transform_12, window_bounds = array<i64: 16, 256>}]} {
    %c0 = arith.constant 0 : index
    %c0_0 = arith.constant 0 : index
    %c0_1 = arith.constant 0 : index
    %0 = vector.load %arg2[%c0, %c0_0, %c0_1] : memref<16x32x16xbf16, #tpu.memory_space<vmem>>, vector<16x32x16xbf16>
    %1 = vector.shape_cast %0 : vector<16x32x16xbf16> to vector<512x16xbf16>
    %c0_2 = arith.constant 0 : index
    %c0_3 = arith.constant 0 : index
    %2 = vector.load %arg3[%c0_2, %c0_3] : memref<16x64xbf16, #tpu.memory_space<vmem>>, vector<16x64xbf16>
    %cst = arith.constant dense<0.000000e+00> : vector<512x64xf32>
    %3 = tpu.matmul %1, %2, %cst {dimension_numbers = #tpu.dot_dimension_numbers<[1], [0], [0], [1], [0, 0, 1, 1], [], []>} : vector<512x16xbf16>, vector<16x64xbf16>, vector<512x64xf32> -> vector<512x64xf32>
    %c0_4 = arith.constant 0 : index
    %c0_5 = arith.constant 0 : index
    %4 = vector.load %arg4[%c0_4, %c0_5] : memref<1x64xf32, #tpu.memory_space<vmem>>, vector<1x64xf32>
    %5 = vector.broadcast %4 : vector<1x64xf32> to vector<512x64xf32>
    %6 = arith.addf %3, %5 : vector<512x64xf32>
    %cst_6 = arith.constant 0.000000e+00 : f32
    %7 = vector.broadcast %cst_6 : f32 to vector<512x64xf32>
    %8 = arith.maximumf %6, %7 : vector<512x64xf32>
    %9 = arith.truncf %8 : vector<512x64xf32> to vector<512x64xbf16>
    %c0_7 = arith.constant 0 : index
    %c0_8 = arith.constant 0 : index
    %10 = vector.load %arg5[%c0_7, %c0_8] : memref<64x128xbf16, #tpu.memory_space<vmem>>, vector<64x128xbf16>
    %cst_9 = arith.constant dense<0.000000e+00> : vector<512x128xf32>
    %11 = tpu.matmul %9, %10, %cst_9 {dimension_numbers = #tpu.dot_dimension_numbers<[1], [0], [0], [1], [0, 0, 1, 1], [], []>} : vector<512x64xbf16>, vector<64x128xbf16>, vector<512x128xf32> -> vector<512x128xf32>
    %c0_10 = arith.constant 0 : index
    %c0_11 = arith.constant 0 : index
    %12 = vector.load %arg6[%c0_10, %c0_11] : memref<1x128xf32, #tpu.memory_space<vmem>>, vector<1x128xf32>
    %13 = vector.broadcast %12 : vector<1x128xf32> to vector<512x128xf32>
    %14 = arith.addf %11, %13 : vector<512x128xf32>
    %cst_12 = arith.constant 0.000000e+00 : f32
    %15 = vector.broadcast %cst_12 : f32 to vector<512x128xf32>
    %16 = arith.maximumf %14, %15 : vector<512x128xf32>
    %17 = arith.truncf %16 : vector<512x128xf32> to vector<512x128xbf16>
    %c0_13 = arith.constant 0 : index
    %c0_14 = arith.constant 0 : index
    %18 = vector.load %arg7[%c0_13, %c0_14] : memref<128x256xbf16, #tpu.memory_space<vmem>>, vector<128x256xbf16>
    %cst_15 = arith.constant dense<0.000000e+00> : vector<512x256xf32>
    %19 = tpu.matmul %17, %18, %cst_15 {dimension_numbers = #tpu.dot_dimension_numbers<[1], [0], [0], [1], [0, 0, 1, 1], [], []>} : vector<512x128xbf16>, vector<128x256xbf16>, vector<512x256xf32> -> vector<512x256xf32>
    %c0_16 = arith.constant 0 : index
    %c0_17 = arith.constant 0 : index
    %20 = vector.load %arg8[%c0_16, %c0_17] : memref<1x256xf32, #tpu.memory_space<vmem>>, vector<1x256xf32>
    %21 = vector.broadcast %20 : vector<1x256xf32> to vector<512x256xf32>
    %22 = arith.addf %19, %21 : vector<512x256xf32>
    %cst_18 = arith.constant 0.000000e+00 : f32
    %23 = vector.broadcast %cst_18 : f32 to vector<512x256xf32>
    %24 = arith.maximumf %22, %23 : vector<512x256xf32>
    %25 = arith.truncf %24 : vector<512x256xf32> to vector<512x256xbf16>
    %26 = vector.shape_cast %25 : vector<512x256xbf16> to vector<16x32x256xbf16>
    %cst_19 = arith.constant dense<0xFF80> : vector<16x256xbf16>
    %27 = vector.multi_reduction <maximumf>, %26, %cst_19 [1] : vector<16x32x256xbf16> to vector<16x256xbf16>
    %c0_i32 = arith.constant 0 : i32
    %28 = arith.cmpi eq, %arg1, %c0_i32 : i32
    %29 = arith.extui %28 : i1 to i32
    %c0_i32_20 = arith.constant 0 : i32
    %30 = arith.cmpi ne, %29, %c0_i32_20 : i32
    scf.if %30 {
      %cst_26 = arith.constant 0xFF800000 : f32
      %38 = vector.broadcast %cst_26 : f32 to vector<16x256xf32>
      %c0_27 = arith.constant 0 : index
      %c0_28 = arith.constant 0 : index
      %39 = vector.load %arg15[%c0_27, %c0_28] : memref<16x256xf32, #tpu.memory_space<vmem>>, vector<16x256xf32>
      tpu.vector_store %arg15[%c0_27, %c0_28], %38 {strides = array<i32>} : memref<16x256xf32, #tpu.memory_space<vmem>>, vector<16x256xf32>,
    } else {
    }
    %c0_21 = arith.constant 0 : index
    %c0_22 = arith.constant 0 : index
    %31 = vector.load %arg15[%c0_21, %c0_22] : memref<16x256xf32, #tpu.memory_space<vmem>>, vector<16x256xf32>
    %32 = arith.extf %27 : vector<16x256xbf16> to vector<16x256xf32>
    %33 = arith.maximumf %31, %32 : vector<16x256xf32>
    %c0_23 = arith.constant 0 : index
    %c0_24 = arith.constant 0 : index
    %34 = vector.load %arg15[%c0_23, %c0_24] : memref<16x256xf32, #tpu.memory_space<vmem>>, vector<16x256xf32>
    tpu.vector_store %arg15[%c0_23, %c0_24], %33 {strides = array<i32>} : memref<16x256xf32, #tpu.memory_space<vmem>>, vector<16x256xf32>,
    %c1_i32 = arith.constant 1 : i32
    %35 = arith.cmpi eq, %arg1, %c1_i32 : i32
    %36 = arith.extui %35 : i1 to i32
    %c0_i32_25 = arith.constant 0 : i32
    %37 = arith.cmpi ne, %36, %c0_i32_25 : i32
    scf.if %37 {
      %c0_26 = arith.constant 0 : index
      %c0_27 = arith.constant 0 : index
      %38 = vector.load %arg15[%c0_26, %c0_27] : memref<16x256xf32, #tpu.memory_space<vmem>>, vector<16x256xf32>
      %39 = arith.truncf %38 : vector<16x256xf32> to vector<16x256xbf16>
      %c0_28 = arith.constant 0 : index
      %c0_29 = arith.constant 0 : index
      %40 = vector.load %arg9[%c0_28, %c0_29] : memref<256x128xbf16, #tpu.memory_space<vmem>>, vector<256x128xbf16>
      %cst_30 = arith.constant dense<0.000000e+00> : vector<16x128xf32>
      %41 = tpu.matmul %39, %40, %cst_30 {dimension_numbers = #tpu.dot_dimension_numbers<[1], [0], [0], [1], [0, 0, 1, 1], [], []>} : vector<16x256xbf16>, vector<256x128xbf16>, vector<16x128xf32> -> vector<16x128xf32>
      %c0_31 = arith.constant 0 : index
      %c0_32 = arith.constant 0 : index
      %42 = vector.load %arg10[%c0_31, %c0_32] : memref<1x128xf32, #tpu.memory_space<vmem>>, vector<1x128xf32>
      %43 = vector.broadcast %42 : vector<1x128xf32> to vector<16x128xf32>
      %44 = arith.addf %41, %43 : vector<16x128xf32>
      %cst_33 = arith.constant 0.000000e+00 : f32
      %45 = vector.broadcast %cst_33 : f32 to vector<16x128xf32>
      %46 = arith.maximumf %44, %45 : vector<16x128xf32>
      %47 = arith.truncf %46 : vector<16x128xf32> to vector<16x128xbf16>
      %c0_34 = arith.constant 0 : index
      %c0_35 = arith.constant 0 : index
      %48 = vector.load %arg11[%c0_34, %c0_35] : memref<128x64xbf16, #tpu.memory_space<vmem>>, vector<128x64xbf16>
      %cst_36 = arith.constant dense<0.000000e+00> : vector<16x64xf32>
      %49 = tpu.matmul %47, %48, %cst_36 {dimension_numbers = #tpu.dot_dimension_numbers<[1], [0], [0], [1], [0, 0, 1, 1], [], []>} : vector<16x128xbf16>, vector<128x64xbf16>, vector<16x64xf32> -> vector<16x64xf32>
      %c0_37 = arith.constant 0 : index
      %c0_38 = arith.constant 0 : index
      %50 = vector.load %arg12[%c0_37, %c0_38] : memref<1x64xf32, #tpu.memory_space<vmem>>, vector<1x64xf32>
      %51 = vector.broadcast %50 : vector<1x64xf32> to vector<16x64xf32>
      %52 = arith.addf %49, %51 : vector<16x64xf32>
      %cst_39 = arith.constant 0.000000e+00 : f32
      %53 = vector.broadcast %cst_39 : f32 to vector<16x64xf32>
      %54 = arith.maximumf %52, %53 : vector<16x64xf32>
      %55 = arith.truncf %54 : vector<16x64xf32> to vector<16x64xbf16>
      %c0_40 = arith.constant 0 : index
      %c0_41 = arith.constant 0 : index
      %56 = vector.load %arg13[%c0_40, %c0_41] : memref<64x256xbf16, #tpu.memory_space<vmem>>, vector<64x256xbf16>
      %cst_42 = arith.constant dense<0.000000e+00> : vector<16x256xf32>
      %57 = tpu.matmul %55, %56, %cst_42 {dimension_numbers = #tpu.dot_dimension_numbers<[1], [0], [0], [1], [0, 0, 1, 1], [], []>} : vector<16x64xbf16>, vector<64x256xbf16>, vector<16x256xf32> -> vector<16x256xf32>
      %c0_43 = arith.constant 0 : index
      %c0_44 = arith.constant 0 : index
      %58 = vector.load %arg14[%c0_43, %c0_44] : memref<16x256xf32, #tpu.memory_space<vmem>>, vector<16x256xf32>
      tpu.vector_store %arg14[%c0_43, %c0_44], %57 {strides = array<i32>} : memref<16x256xf32, #tpu.memory_space<vmem>>, vector<16x256xf32>,
    } else {
    }
    return
  }
  func.func @transform_0(%arg0: i32, %arg1: i32) -> (i32, i32, i32) {
    %c0_i32 = arith.constant 0 : i32
    %c0_i32_0 = arith.constant 0 : i32
    return %arg0, %arg1, %c0_i32 : i32, i32, i32
  }
  func.func @transform_1(%arg0: i32, %arg1: i32) -> (i32, i32) {
    %c0_i32 = arith.constant 0 : i32
    %c0_i32_0 = arith.constant 0 : i32
    %c0_i32_1 = arith.constant 0 : i32
    return %c0_i32, %c0_i32_0 : i32, i32
  }
  func.func @transform_2(%arg0: i32, %arg1: i32) -> (i32, i32) {
    %c0_i32 = arith.constant 0 : i32
    %c0_i32_0 = arith.constant 0 : i32
    %c0_i32_1 = arith.constant 0 : i32
    return %c0_i32, %c0_i32_0 : i32, i32
  }
  func.func @transform_3(%arg0: i32, %arg1: i32) -> (i32, i32) {
    %c0_i32 = arith.constant 0 : i32
    %c0_i32_0 = arith.constant 0 : i32
    %c0_i32_1 = arith.constant 0 : i32
    return %c0_i32, %c0_i32_0 : i32, i32
  }
  func.func @transform_4(%arg0: i32, %arg1: i32) -> (i32, i32) {
    %c0_i32 = arith.constant 0 : i32
    %c0_i32_0 = arith.constant 0 : i32
    %c0_i32_1 = arith.constant 0 : i32
    return %c0_i32, %c0_i32_0 : i32, i32
  }
  func.func @transform_5(%arg0: i32, %arg1: i32) -> (i32, i32) {
    %c0_i32 = arith.constant 0 : i32
    %c0_i32_0 = arith.constant 0 : i32
    %c0_i32_1 = arith.constant 0 : i32
    return %c0_i32, %c0_i32_0 : i32, i32
  }
  func.func @transform_6(%arg0: i32, %arg1: i32) -> (i32, i32) {
    %c0_i32 = arith.constant 0 : i32
    %c0_i32_0 = arith.constant 0 : i32
    %c0_i32_1 = arith.constant 0 : i32
    return %c0_i32, %c0_i32_0 : i32, i32
  }
  func.func @transform_7(%arg0: i32, %arg1: i32) -> (i32, i32) {
    %c0_i32 = arith.constant 0 : i32
    %c0_i32_0 = arith.constant 0 : i32
    %c0_i32_1 = arith.constant 0 : i32
    return %c0_i32, %c0_i32_0 : i32, i32
  }
  func.func @transform_8(%arg0: i32, %arg1: i32) -> (i32, i32) {
    %c0_i32 = arith.constant 0 : i32
    %c0_i32_0 = arith.constant 0 : i32
    %c0_i32_1 = arith.constant 0 : i32
    return %c0_i32, %c0_i32_0 : i32, i32
  }
  func.func @transform_9(%arg0: i32, %arg1: i32) -> (i32, i32) {
    %c0_i32 = arith.constant 0 : i32
    %c0_i32_0 = arith.constant 0 : i32
    %c0_i32_1 = arith.constant 0 : i32
    return %c0_i32, %c0_i32_0 : i32, i32
  }
  func.func @transform_10(%arg0: i32, %arg1: i32) -> (i32, i32) {
    %c0_i32 = arith.constant 0 : i32
    %c0_i32_0 = arith.constant 0 : i32
    %c0_i32_1 = arith.constant 0 : i32
    return %c0_i32, %c0_i32_0 : i32, i32
  }
  func.func @transform_11(%arg0: i32, %arg1: i32) -> (i32, i32) {
    %c0_i32 = arith.constant 0 : i32
    %c0_i32_0 = arith.constant 0 : i32
    %c0_i32_1 = arith.constant 0 : i32
    return %c0_i32, %c0_i32_0 : i32, i32
  }
  func.func @transform_12(%arg0: i32, %arg1: i32) -> (i32, i32) {
    %c0_i32 = arith.constant 0 : i32
    %c0_i32_0 = arith.constant 0 : i32
    return %arg0, %c0_i32 : i32, i32
  }
}

</mosaic_0001>

<bundles_post_ra>
// kernel: stnkd_forward.1
= control target key start
LH: loop header
LB: loop body
LE: loop exit
PB: predicated region body
PF: predicated region fallthrough
CT: control target
= control target key end

     0   :  { %s4273_s21 = smov 0   ;;  %s4275_s22 = smov 0   ;;  %s5377_s0 = inlined_call_operand.vmem [shape: bf16[16,64,16], index: 0, kind: input, shape index: {}]   ;;  %s5378_s1 = inlined_call_operand.vmem [shape: bf16[16,64], index: 1, kind: input, shape index: {}]   ;;  %s5379_s2 = inlined_call_operand.vmem [shape: f32[1,64], index: 2, kind: input, shape index: {}]   ;;  %s5380_s3 = inlined_call_operand.vmem [shape: bf16[64,128], index: 3, kind: input, shape index: {}]   ;;  %s5381_s4 = inlined_call_operand.vmem [shape: f32[1,128], index: 4, kind: input, shape index: {}]   ;;  %s5382_s5 = inlined_call_operand.vmem [shape: bf16[128,256], index: 5, kind: input, shape index: {}]   ;;  %s5383_s6 = inlined_call_operand.vmem [shape: f32[1,256], index: 6, kind: input, shape index: {}]   ;;  %s5384_s7 = inlined_call_operand.vmem [shape: bf16[256,128], index: 7, kind: input, shape index: {}]   ;;  %s5385_s8 = inlined_call_operand.vmem [shape: f32[1,128], index: 8, kind: input, shape index: {}]   ;;  %s5386_s9 = inlined_call_operand.vmem [shape: bf16[128,64], index: 9, kind: input, shape index: {}]   ;;  %s5387_s10 = inlined_call_operand.vmem [shape: f32[1,64], index: 10, kind: input, shape index: {}]   ;;  %s5388_s11 = inlined_call_operand.vmem [shape: bf16[64,256], index: 11, kind: input, shape index: {}]   ;;  %s5389_s12 = inlined_call_operand.vmem [shape: f32[16,256], index: 12, kind: output, shape index: {}]  }
   0x1   :  { %s4277_s23 = smov 0   ;;  %s4279_s24 = smov 0  }
   0x2   :  { %s4281_s25 = smov 0  }
   0x3 LB: > { %s31_s26 = sadd.s32 1, %s4197_s24  ;;  %p50_p1 = scmp.ne.s32.totalorder %s4189_s22, %s4185_s21  ;;  %s4201_s25 = sphi %s4281_s25, %s22_s25   ;;  %s4197_s24 = sphi %s4279_s24, %s5422_s24   ;;  %s4193_s23 = sphi %s4277_s23, %s5421_s23   ;;  %s4189_s22 = sphi %s4275_s22, %s5420_s22   ;;  %s4185_s21 = sphi %s4273_s21, %s5419_s21  }
   0x4   : > { %p32_p0 = scmp.ge.s32.totalorder %s31_s26, 2  ;;  %p51_p2 = scmp.eq.s32.totalorder %s4201_s25, 0 }
   0x5   : > { %s43_s28 = sadd.s32 1, %s4189_s22  ;;  %p3580_p5 = scmp.ge.s32.totalorder %s4201_s25, 2 }
   0x6   : > { %s5424_s26 = smov (%p32_p0, %s31_s26), 0  ;;  %p52_p3 = por %p51_p2, %p50_p1 }
   0x7   : > { %s39_s27 = ssub.s32 %s4197_s24, %s5424_s26  ;;  %366 = sbr.rel (%p3580_p5) target bundleno = 32 (0x20), region = 60 }
   0x8   : > { %p41_p4 = scmp.eq.s32.totalorder %s39_s27, 0 }
   0xa   : > { %s4308_s29 = scalar_select %p41_p4, %s4189_s22, %s43_s28  }
   0xc   : > { %369 = sbr.rel (!%p52_p3) target bundleno = 32 (0x20), region = 64  ;;  %s371_s30 = sand.u32 (%p52_p3), 1, %s4189_s22  }
   0xd   : > { %s3746_s13 = sshll.u32 (%p52_p3), %s4197_s24, 4  ;;  %s3581_s14 = sshll.u32 (%p52_p3), %s371_s30, 8 }
   0xe   : > { %s4316_s17 = scalar_lea.vmem (%p52_p3), %s5377_s0, %s3746_s13  ;;  %s4321_s18 = scalar_lea.vmem (%p52_p3), [#allocation3], %s3581_s14 }
   0xf   : > { %v396_v0 = vld [vmem:[%s4316_s17] sm:$0xff] (%p52_p3)   ;;  %v400_v1 = vld [vmem:[%s4316_s17 + $0x8] sm:$0xff] (%p52_p3)  }
  0x10   : > { %v404_v2 = vld [vmem:[%s4316_s17 + $0x20] sm:$0xff] (%p52_p3)   ;;  %397 = vst [vmem:[%s4321_s18] sm:$0xff] (%p52_p3), %v396_v0   ;;  %401 = vst [vmem:[%s4321_s18 + $0x8] sm:$0xff] (%p52_p3), %v400_v1   ;;  %v408_v3 = vld [vmem:[%s4316_s17 + $0x28] sm:$0xff] (%p52_p3)  }
  0x11   : > { %405 = vst [vmem:[%s4321_s18 + $0x10] sm:$0xff] %v404_v2   ;;  %v412_v4 = vld [vmem:[%s4316_s17 + $0x40] sm:$0xff]   ;;  %v416_v5 = vld [vmem:[%s4316_s17 + $0x48] sm:$0xff]   ;;  %409 = vst [vmem:[%s4321_s18 + $0x18] sm:$0xff] %v408_v3  }
  0x12   : > { %413 = vst [vmem:[%s4321_s18 + $0x20] sm:$0xff] %v412_v4   ;;  %417 = vst [vmem:[%s4321_s18 + $0x28] sm:$0xff] %v416_v5   ;;  %v420_v6 = vld [vmem:[%s4316_s17 + $0x60] sm:$0xff]   ;;  %v424_v7 = vld [vmem:[%s4316_s17 + $0x68] sm:$0xff]  }
  0x13   : > { %v428_v8 = vld [vmem:[%s4316_s17 + $0x80] sm:$0xff]   ;;  %421 = vst [vmem:[%s4321_s18 + $0x30] sm:$0xff] %v420_v6   ;;  %425 = vst [vmem:[%s4321_s18 + $0x38] sm:$0xff] %v424_v7   ;;  %v432_v9 = vld [vmem:[%s4316_s17 + $0x88] sm:$0xff]  }
  0x14   : > { %429 = vst [vmem:[%s4321_s18 + $0x40] sm:$0xff] %v428_v8   ;;  %v436_v10 = vld [vmem:[%s4316_s17 + $0xa0] sm:$0xff]   ;;  %v440_v11 = vld [vmem:[%s4316_s17 + $0xa8] sm:$0xff]   ;;  %433 = vst [vmem:[%s4321_s18 + $0x48] sm:$0xff] %v432_v9  }
  0x15   : > { %437 = vst [vmem:[%s4321_s18 + $0x50] sm:$0xff] %v436_v10   ;;  %441 = vst [vmem:[%s4321_s18 + $0x58] sm:$0xff] %v440_v11   ;;  %v444_v12 = vld [vmem:[%s4316_s17 + $0xc0] sm:$0xff]   ;;  %v448_v13 = vld [vmem:[%s4316_s17 + $0xc8] sm:$0xff]  }
  0x16   : > { %v452_v14 = vld [vmem:[%s4316_s17 + $0xe0] sm:$0xff]   ;;  %445 = vst [vmem:[%s4321_s18 + $0x60] sm:$0xff] %v444_v12   ;;  %449 = vst [vmem:[%s4321_s18 + $0x68] sm:$0xff] %v448_v13   ;;  %v456_v15 = vld [vmem:[%s4316_s17 + $0xe8] sm:$0xff]  }
  0x17   : > { %453 = vst [vmem:[%s4321_s18 + $0x70] sm:$0xff] %v452_v14   ;;  %v460_v16 = vld [vmem:[%s4316_s17 + $0x100] sm:$0xff]   ;;  %v464_v17 = vld [vmem:[%s4316_s17 + $0x108] sm:$0xff]   ;;  %457 = vst [vmem:[%s4321_s18 + $0x78] sm:$0xff] %v456_v15  }
  0x18   : > { %461 = vst [vmem:[%s4321_s18 + $0x80] sm:$0xff] %v460_v16   ;;  %465 = vst [vmem:[%s4321_s18 + $0x88] sm:$0xff] %v464_v17   ;;  %v468_v18 = vld [vmem:[%s4316_s17 + $0x120] sm:$0xff]   ;;  %v472_v19 = vld [vmem:[%s4316_s17 + $0x128] sm:$0xff]  }
  0x19   : > { %v476_v20 = vld [vmem:[%s4316_s17 + $0x140] sm:$0xff]   ;;  %469 = vst [vmem:[%s4321_s18 + $0x90] sm:$0xff] %v468_v18   ;;  %473 = vst [vmem:[%s4321_s18 + $0x98] sm:$0xff] %v472_v19   ;;  %v480_v21 = vld [vmem:[%s4316_s17 + $0x148] sm:$0xff]  }
  0x1a   : > { %477 = vst [vmem:[%s4321_s18 + $0xa0] sm:$0xff] %v476_v20   ;;  %v484_v22 = vld [vmem:[%s4316_s17 + $0x160] sm:$0xff]   ;;  %v488_v23 = vld [vmem:[%s4316_s17 + $0x168] sm:$0xff]   ;;  %481 = vst [vmem:[%s4321_s18 + $0xa8] sm:$0xff] %v480_v21  }
  0x1b   : > { %485 = vst [vmem:[%s4321_s18 + $0xb0] sm:$0xff] %v484_v22   ;;  %489 = vst [vmem:[%s4321_s18 + $0xb8] sm:$0xff] %v488_v23   ;;  %v492_v24 = vld [vmem:[%s4316_s17 + $0x180] sm:$0xff]   ;;  %v496_v25 = vld [vmem:[%s4316_s17 + $0x188] sm:$0xff]  }
  0x1c   : > { %v500_v26 = vld [vmem:[%s4316_s17 + $0x1a0] sm:$0xff]   ;;  %493 = vst [vmem:[%s4321_s18 + $0xc0] sm:$0xff] %v492_v24   ;;  %497 = vst [vmem:[%s4321_s18 + $0xc8] sm:$0xff] %v496_v25   ;;  %v504_v27 = vld [vmem:[%s4316_s17 + $0x1a8] sm:$0xff]  }
  0x1d   : > { %501 = vst [vmem:[%s4321_s18 + $0xd0] sm:$0xff] %v500_v26   ;;  %v508_v28 = vld [vmem:[%s4316_s17 + $0x1c0] sm:$0xff]   ;;  %v512_v29 = vld [vmem:[%s4316_s17 + $0x1c8] sm:$0xff]   ;;  %505 = vst [vmem:[%s4321_s18 + $0xd8] sm:$0xff] %v504_v27  }
  0x1e   : > { %509 = vst [vmem:[%s4321_s18 + $0xe0] sm:$0xff] %v508_v28   ;;  %513 = vst [vmem:[%s4321_s18 + $0xe8] sm:$0xff] %v512_v29   ;;  %v516_v30 = vld [vmem:[%s4316_s17 + $0x1e0] sm:$0xff]   ;;  %v520_v31 = vld [vmem:[%s4316_s17 + $0x1e8] sm:$0xff]  }
  0x1f   : > { %517 = vst [vmem:[%s4321_s18 + $0xf0] sm:$0xff] %v516_v30   ;;  %521 = vst [vmem:[%s4321_s18 + $0xf8] sm:$0xff] %v520_v31  }
  0x20 PF: > { %p3584_p6 = scmp.ge.s32.totalorder %s4201_s25, 1  ;;  %p674_p7 = scmp.lt.s32.totalorder %s4201_s25, 3 }
  0x22   : > { %p675_p8 = pnand %p3584_p6, %p674_p7 }
  0x24   : > { %678 = sbr.rel (%p675_p8) target bundleno = 1533 (0x5fd), region = 105 }
  0x29   : > { %v4066_v32 = vld [vmem:[%s5378_s1] sm:$0xff]   ;;  %s681_s27 = sand.u32 1, %s4185_s21   ;;  %vm972_vm0 = vcmask 130048   ;;  %v4099_v33 = vld [vmem:[%s5380_s3 + $0x18] sm:$0xff]   ;;  %v4100_v53 = vld [vmem:[%s5380_s3 + $0x10] sm:$0xff]   ;;  %vm1493_vm1 = vcmask 523264  }
  0x2a   : > { %s3585_s28 = sshll.u32 %s681_s27, 8  ;;  %3847 = vmatprep.subr.bf16.mxu0 %v4066_v32  ;;  %3913 = vmatprep.subr.bf16.mxu1 %v4099_v33  ;;  %v4101_v55 = vld [vmem:[%s5380_s3 + $0x8] sm:$0xff]   ;;  %v4102_v57 = vld [vmem:[%s5380_s3] sm:$0xff]   ;;  %v4103_v5 = vld [vmem:[%s5382_s5 + $0x70] ss:$8 sps:$4 sm:$0xff]   ;;  %p3705_p9 = scmp.ne.s32.totalorder %s4193_s23, 0 }
  0x2b   : > { %3848 = vmatpush3.bf16.msra.mxu0 %v4066_v32  ;;  %s4393_s14 = scalar_lea.vmem [#allocation3], %s3585_s28  ;;  %3914 = vmatpush3.bf16.msra.mxu1 %v4099_v33  ;;  %v4105_v6 = vld [vmem:[%s5382_s5 + $0x74] ss:$8 sps:$4 sm:$0xff]   ;;  %v4106_v7 = vld [vmem:[%s5382_s5 + $0x60] ss:$8 sps:$4 sm:$0xff]  }
  0x2c   : > { %v4067_v34 = vld [vmem:[%s4393_s14] sm:$0xff]   ;;  %v4068_v35 = vld [vmem:[%s4393_s14 + $0x8] sm:$0xff]   ;;  %v4069_v36 = vld [vmem:[%s4393_s14 + $0x10] sm:$0xff]   ;;  %3915 = vmatprep.subr.bf16.mxu1 %v4100_v53  ;;  %2083 = vmatprep.subr.bf16.mxu0 %v4105_v6 }
  0x2d   : > { %3849 = vmatprep.mubr.msk.bf16.mxu0 %vm972_vm0, %v4067_v34  ;;  %v4070_v37 = vld [vmem:[%s4393_s14 + $0x18] sm:$0xff]   ;;  %v4071_v38 = vld [vmem:[%s4393_s14 + $0x20] sm:$0xff]   ;;  %v4072_v39 = vld [vmem:[%s4393_s14 + $0x28] sm:$0xff]  }
  0x2e   : > { %3850 = vmatmul.mubr.msk.bf16.vlgmr.msra.gmra.mxu0 %vm972_vm0, %v4068_v35  ;;  %v4073_v40 = vld [vmem:[%s4393_s14 + $0x30] sm:$0xff]   ;;  %v4074_v41 = vld [vmem:[%s4393_s14 + $0x38] sm:$0xff]   ;;  %v4075_v42 = vld [vmem:[%s4393_s14 + $0x40] sm:$0xff]  }
  0x2f   : > { %3853 = vmatprep.mubr.msk.bf16.mxu0 %vm972_vm0, %v4069_v36  ;;  %v4076_v43 = vld [vmem:[%s4393_s14 + $0x48] sm:$0xff]   ;;  %v4077_v44 = vld [vmem:[%s4393_s14 + $0x50] sm:$0xff]   ;;  %v4078_v45 = vld [vmem:[%s4393_s14 + $0x58] sm:$0xff]   ;;  %3916 = vmatpush3.bf16.msra.mxu1 %v4100_v53 }
  0x30   : > { %v4079_v46 = vld [vmem:[%s4393_s14 + $0x60] sm:$0xff]   ;;  %v4080_v47 = vld [vmem:[%s4393_s14 + $0x68] sm:$0xff]   ;;  %v4081_v48 = vld [vmem:[%s4393_s14 + $0x70] sm:$0xff]   ;;  %3917 = vmatprep.subr.bf16.mxu1 %v4101_v55  ;;  %2084 = vmatpush1.bf16.msra.mxu0 %v4103_v5 }
  0x31   : > { %v4082_v49 = vld [vmem:[%s4393_s14 + $0x78] sm:$0xff]   ;;  %v4083_v50 = vld [vmem:[%s4393_s14 + $0x80] sm:$0xff]   ;;  %v4084_v51 = vld [vmem:[%s4393_s14 + $0x88] sm:$0xff]  }
  0x32   : > { %v4085_v52 = vld [vmem:[%s4393_s14 + $0x90] sm:$0xff]   ;;  %v4086_v54 = vld [vmem:[%s4393_s14 + $0x98] sm:$0xff]   ;;  %v4087_v56 = vld [vmem:[%s4393_s14 + $0xa0] sm:$0xff]  }
  0x33   : > { %3918 = vmatpush3.bf16.msra.mxu1 %v4101_v55  ;;  %v4088_v58 = vld [vmem:[%s4393_s14 + $0xa8] sm:$0xff]   ;;  %v4089_v59 = vld [vmem:[%s4393_s14 + $0xb0] sm:$0xff]   ;;  %v4090_v60 = vld [vmem:[%s4393_s14 + $0xb8] sm:$0xff]  }
  0x34   : > { %3919 = vmatprep.subr.bf16.mxu1 %v4102_v57  ;;  %v4091_v61 = vld [vmem:[%s4393_s14 + $0xc0] sm:$0xff]   ;;  %v4092_v62 = vld [vmem:[%s4393_s14 + $0xc8] sm:$0xff]   ;;  %v4093_v63 = vld [vmem:[%s4393_s14 + $0xd0] sm:$0xff]  }
  0x35   : > { %v4094_v0 = vld [vmem:[%s4393_s14 + $0xd8] sm:$0xff]   ;;  %v4095_v1 = vld [vmem:[%s4393_s14 + $0xe0] sm:$0xff]   ;;  %v4096_v2 = vld [vmem:[%s4393_s14 + $0xe8] sm:$0xff]  }
  0x36   : > { %3854 = vmatmul.mubr.msk.bf16.gmra.mxu0 %vm972_vm0, %v4070_v37  ;;  %v4097_v3 = vld [vmem:[%s4393_s14 + $0xf0] sm:$0xff]   ;;  %v4098_v4 = vld [vmem:[%s4393_s14 + $0xf8] sm:$0xff]   ;;  %v4108_v8 = vld [vmem:[%s5382_s5 + $0x64] ss:$8 sps:$4 sm:$0xff]  }
  0x37   : > { %3857 = vmatprep.mubr.msk.bf16.mxu0 %vm972_vm0, %v4071_v38  ;;  %3920 = vmatpush3.bf16.msra.mxu1 %v4102_v57  ;;  %v4483_v11 = vld [vmem:[%s5379_s2] ss:$0 sm:$0xff]  ;;  %v4109_v17 = vld [vmem:[%s5382_s5 + $0x50] ss:$8 sps:$4 sm:$0xff]   ;;  %v4111_v18 = vld [vmem:[%s5382_s5 + $0x54] ss:$8 sps:$4 sm:$0xff]  }
  0x38   : > { %4005 = vmatprep.subr.bf16.mxu1 %v4105_v6  ;;  %2085 = vmatprep.subr.bf16.mxu0 %v4108_v8  ;;  %v4114_v20 = vld [vmem:[%s5382_s5 + $0x44] ss:$8 sps:$4 sm:$0xff]   ;;  %v4112_v25 = vld [vmem:[%s5382_s5 + $0x40] ss:$8 sps:$4 sm:$0xff]   ;;  %v4117_v28 = vld [vmem:[%s5382_s5 + $0x34] ss:$8 sps:$4 sm:$0xff]  }
  0x39   : > { %2086 = vmatpush1.bf16.msra.mxu0 %v4106_v7  ;;  %v4115_v34 = vld [vmem:[%s5382_s5 + $0x30] ss:$8 sps:$4 sm:$0xff]  }
  0x3a   : > { %2087 = vmatprep.subr.bf16.mxu0 %v4111_v18 }
  0x3d   : > { %2088 = vmatpush1.bf16.msra.mxu0 %v4109_v17 }
  0x3e   : > { %3858 = vmatmul.mubr.msk.bf16.gmra.mxu0 %vm972_vm0, %v4072_v39  ;;  %2089 = vmatprep.subr.bf16.mxu0 %v4114_v20 }
  0x3f   : > { %3861 = vmatprep.mubr.msk.bf16.mxu0 %vm972_vm0, %v4073_v40 }
  0x41   : > { %2090 = vmatpush1.bf16.msra.mxu0 %v4112_v25 }
  0x42   : > { %2091 = vmatprep.subr.bf16.mxu0 %v4117_v28 }
  0x45   : > { %2092 = vmatpush1.bf16.msra.mxu0 %v4115_v34 }
  0x46   : > { %3862 = vmatmul.mubr.msk.bf16.gmra.mxu0 %vm972_vm0, %v4074_v41 }
  0x47   : > { %3865 = vmatprep.mubr.msk.bf16.mxu0 %vm972_vm0, %v4075_v42 }
  0x4e   : > { %3866 = vmatmul.mubr.msk.bf16.gmra.mxu0 %vm972_vm0, %v4076_v43 }
  0x4f   : > { %3869 = vmatprep.mubr.msk.bf16.mxu0 %vm972_vm0, %v4077_v44 }
  0x56   : > { %3870 = vmatmul.mubr.msk.bf16.gmra.mxu0 %vm972_vm0, %v4078_v45 }
  0x57   : > { %3873 = vmatprep.mubr.msk.bf16.mxu0 %vm972_vm0, %v4079_v46 }
  0x5e   : > { %3874 = vmatmul.mubr.msk.bf16.gmra.mxu0 %vm972_vm0, %v4080_v47 }
  0x5f   : > { %3877 = vmatprep.mubr.msk.bf16.mxu0 %vm972_vm0, %v4081_v48 }
  0x66   : > { %3878 = vmatmul.mubr.msk.bf16.gmra.mxu0 %vm972_vm0, %v4082_v49 }
  0x67   : > { %3881 = vmatprep.mubr.msk.bf16.mxu0 %vm972_vm0, %v4083_v50 }
  0x6e   : > { %3882 = vmatmul.mubr.msk.bf16.gmra.mxu0 %vm972_vm0, %v4084_v51 }
  0x6f   : > { %3885 = vmatprep.mubr.msk.bf16.mxu0 %vm972_vm0, %v4085_v52 }
  0x76   : > { %3886 = vmatmul.mubr.msk.bf16.gmra.mxu0 %vm972_vm0, %v4086_v54 }
  0x77   : > { %3889 = vmatprep.mubr.msk.bf16.mxu0 %vm972_vm0, %v4087_v56 }
  0x7e   : > { %3890 = vmatmul.mubr.msk.bf16.gmra.mxu0 %vm972_vm0, %v4088_v58 }
  0x7f   : > { %3893 = vmatprep.mubr.msk.bf16.mxu0 %vm972_vm0, %v4089_v59 }
  0x86   : > { %3894 = vmatmul.mubr.msk.bf16.gmra.mxu0 %vm972_vm0, %v4090_v60 }
  0x87   : > { %3897 = vmatprep.mubr.msk.bf16.mxu0 %vm972_vm0, %v4091_v61 }
  0x8e   : > { %3898 = vmatmul.mubr.msk.bf16.gmra.mxu0 %vm972_vm0, %v4092_v62 }
  0x8f   : > { %3901 = vmatprep.mubr.msk.bf16.mxu0 %vm972_vm0, %v4093_v63 }
  0x96   : > { %3902 = vmatmul.mubr.msk.bf16.gmra.mxu0 %vm972_vm0, %v4094_v0 }
  0x97   : > { %3905 = vmatprep.mubr.msk.bf16.mxu0 %vm972_vm0, %v4095_v1 }
  0x9e   : > { %3906 = vmatmul.mubr.msk.bf16.gmra.mxu0 %vm972_vm0, %v4096_v2 }
  0x9f   : > { %3909 = vmatprep.mubr.msk.bf16.mxu0 %vm972_vm0, %v4097_v3 }
  0xa6   : > { %3910 = vmatmul.mubr.msk.bf16.gmra.mxu0 %vm972_vm0, %v4098_v4 }
  0xee   : > { %v3851_v9 = vpop.f32.mrf.mxu0 }
  0xef   : > { %v1112_v15 = vadd.f32 %v3851_v9, %v4483_v11 }
  0xf0   : > { %v1103_v10 = vpop.f32.mrf.mxu0 }
  0xf1   : > { %v1104_v13 = vadd.f32 %v4483_v11, %v1103_v10  ;;  %v1360_v26 = vmax.f32 %v1112_v15, 0.0 }
  0xf2   : > { %v3852_v12 = vpop.f32.mrf.mxu0 }
  0xf3   : > { %v1115_v14 = vadd.f32 %v3852_v12, %v4483_v11  ;;  %v1358_v23 = vmax.f32 %v1104_v13, 0.0 }
  0xf4   : > { %v1106_v16 = vpop.f32.mrf.mxu0 }
  0xf5   : > { %v1107_v19 = vadd.f32 %v4483_v11, %v1106_v16  ;;  %v1361_v21 = vmax.f32 %v1115_v14, 0.0 }
  0xf6   : > { %v3855_v22 = vpop.f32.mrf.mxu0 }
  0xf7   : > { %v1359_v24 = vmax.f32 %v1107_v19, 0.0  ;;  %v1423_v30 = vpack.c.bf16 %v1361_v21, %v1360_v26  ;;  %v1128_v35 = vadd.f32 %v3855_v22, %v4483_v11 }
  0xf8   : > { %v1119_v27 = vpop.f32.mrf.mxu0 }
  0xf9   : > { %v1422_v29 = vpack.c.bf16 %v1359_v24, %v1358_v23  ;;  %v1120_v32 = vadd.f32 %v4483_v11, %v1119_v27  ;;  %v1364_v42 = vmax.f32 %v1128_v35, 0.0 }
  0xfa   : > { %v3856_v31 = vpop.f32.mrf.mxu0 }
  0xfb   : > { %v1131_v33 = vadd.f32 %v3856_v31, %v4483_v11  ;;  %3921 = vmatprep.mubr.msk.bf16.mxu1 %vm1493_vm1, %v1422_v29  ;;  %v1362_v40 = vmax.f32 %v1120_v32, 0.0 }
  0xfc   : > { %v1122_v36 = vpop.f32.mrf.mxu0  ;;  %3922 = vmatmul.mubr.msk.bf16.vlgmr.msra.gmra.mxu1 %vm1493_vm1, %v1423_v30 }
  0xfd   : > { %v1123_v37 = vadd.f32 %v4483_v11, %v1122_v36  ;;  %4013 = vmatpush1.bf16.msra.mxu1 %v4103_v5  ;;  %v1365_v38 = vmax.f32 %v1131_v33, 0.0 }
  0xfe   : > { %v3859_v39 = vpop.f32.mrf.mxu0  ;;  %4006 = vmatprep.subr.bf16.mxu1 %v4108_v8 }
  0xff   : > { %v1363_v41 = vmax.f32 %v1123_v37, 0.0  ;;  %v1425_v45 = vpack.c.bf16 %v1365_v38, %v1364_v42  ;;  %v1144_v49 = vadd.f32 %v3859_v39, %v4483_v11 }
 0x100   : > { %v1135_v43 = vpop.f32.mrf.mxu0 }
 0x101   : > { %v1424_v44 = vpack.c.bf16 %v1363_v41, %v1362_v40  ;;  %4014 = vmatpush1.bf16.msra.mxu1 %v4106_v7  ;;  %v1136_v47 = vadd.f32 %v4483_v11, %v1135_v43  ;;  %v1368_v56 = vmax.f32 %v1144_v49, 0.0 }
 0x102   : > { %v3860_v46 = vpop.f32.mrf.mxu0  ;;  %4007 = vmatprep.subr.bf16.mxu1 %v4111_v18 }
 0x103   : > { %v1147_v48 = vadd.f32 %v3860_v46, %v4483_v11  ;;  %3925 = vmatprep.mubr.msk.bf16.mxu1 %vm1493_vm1, %v1424_v44  ;;  %v1366_v54 = vmax.f32 %v1136_v47, 0.0 }
 0x104   : > { %v1138_v50 = vpop.f32.mrf.mxu0  ;;  %3926 = vmatmul.mubr.msk.bf16.gmra.mxu1 %vm1493_vm1, %v1425_v45 }
 0x105   : > { %v1139_v51 = vadd.f32 %v4483_v11, %v1138_v50  ;;  %4015 = vmatpush1.bf16.msra.mxu1 %v4109_v17  ;;  %v1369_v52 = vmax.f32 %v1147_v48, 0.0 }
 0x106   : > { %v3863_v53 = vpop.f32.mrf.mxu0  ;;  %4008 = vmatprep.subr.bf16.mxu1 %v4114_v20 }
 0x107   : > { %v1367_v55 = vmax.f32 %v1139_v51, 0.0  ;;  %v1427_v59 = vpack.c.bf16 %v1369_v52, %v1368_v56  ;;  %v1160_v63 = vadd.f32 %v3863_v53, %v4483_v11 }
 0x108   : > { %v1151_v57 = vpop.f32.mrf.mxu0 }
 0x109   : > { %v1426_v58 = vpack.c.bf16 %v1367_v55, %v1366_v54  ;;  %4016 = vmatpush1.bf16.msra.mxu1 %v4112_v25  ;;  %v1152_v61 = vadd.f32 %v4483_v11, %v1151_v57  ;;  %v1372_v6 = vmax.f32 %v1160_v63, 0.0 }
 0x10a   : > { %v3864_v60 = vpop.f32.mrf.mxu0  ;;  %4009 = vmatprep.subr.bf16.mxu1 %v4117_v28 }
 0x10b   : > { %v1163_v62 = vadd.f32 %v3864_v60, %v4483_v11  ;;  %3929 = vmatprep.mubr.msk.bf16.mxu1 %vm1493_vm1, %v1426_v58  ;;  %v1370_v4 = vmax.f32 %v1152_v61, 0.0 }
 0x10c   : > { %v1154_v0 = vpop.f32.mrf.mxu0  ;;  %3930 = vmatmul.mubr.msk.bf16.gmra.mxu1 %vm1493_vm1, %v1427_v59 }
 0x10d   : > { %v1155_v1 = vadd.f32 %v4483_v11, %v1154_v0  ;;  %4017 = vmatpush1.bf16.msra.mxu1 %v4115_v34  ;;  %v1373_v2 = vmax.f32 %v1163_v62, 0.0 }
 0x10e   : > { %v3867_v3 = vpop.f32.mrf.mxu0 }
 0x10f   : > { %v1371_v5 = vmax.f32 %v1155_v1, 0.0  ;;  %v1429_v9 = vpack.c.bf16 %v1373_v2, %v1372_v6  ;;  %v1176_v14 = vadd.f32 %v3867_v3, %v4483_v11 }
 0x110   : > { %v1167_v7 = vpop.f32.mrf.mxu0 }
 0x111   : > { %v1428_v8 = vpack.c.bf16 %v1371_v5, %v1370_v4  ;;  %v1168_v12 = vadd.f32 %v4483_v11, %v1167_v7  ;;  %v1376_v21 = vmax.f32 %v1176_v14, 0.0 }
 0x112   : > { %v3868_v10 = vpop.f32.mrf.mxu0 }
 0x113   : > { %v1179_v13 = vadd.f32 %v3868_v10, %v4483_v11  ;;  %3933 = vmatprep.mubr.msk.bf16.mxu1 %vm1493_vm1, %v1428_v8  ;;  %v1374_v19 = vmax.f32 %v1168_v12, 0.0 }
 0x114   : > { %v1170_v15 = vpop.f32.mrf.mxu0  ;;  %3934 = vmatmul.mubr.msk.bf16.gmra.mxu1 %vm1493_vm1, %v1429_v9 }
 0x115   : > { %v1171_v16 = vadd.f32 %v4483_v11, %v1170_v15  ;;  %v1377_v17 = vmax.f32 %v1179_v13, 0.0 }
 0x116   : > { %v3871_v18 = vpop.f32.mrf.mxu0 }
 0x117   : > { %v1375_v20 = vmax.f32 %v1171_v16, 0.0  ;;  %v1431_v24 = vpack.c.bf16 %v1377_v17, %v1376_v21  ;;  %v1192_v28 = vadd.f32 %v3871_v18, %v4483_v11  ;;  %v4120_v21 = vld [vmem:[%s5382_s5 + $0x24] ss:$8 sps:$4 sm:$0xff]  }
 0x118   : > { %v1183_v22 = vpop.f32.mrf.mxu0  ;;  %2093 = vmatprep.subr.bf16.mxu0 %v4120_v21  ;;  %4010 = vmatprep.subr.bf16.mxu1 %v4120_v21 }
 0x119   : > { %v1430_v23 = vpack.c.bf16 %v1375_v20, %v1374_v19  ;;  %v1184_v26 = vadd.f32 %v4483_v11, %v1183_v22  ;;  %v1380_v35 = vmax.f32 %v1192_v28, 0.0 }
 0x11a   : > { %v3872_v25 = vpop.f32.mrf.mxu0 }
 0x11b   : > { %v1195_v27 = vadd.f32 %v3872_v25, %v4483_v11  ;;  %3937 = vmatprep.mubr.msk.bf16.mxu1 %vm1493_vm1, %v1430_v23  ;;  %v1378_v33 = vmax.f32 %v1184_v26, 0.0 }
 0x11c   : > { %v1186_v29 = vpop.f32.mrf.mxu0  ;;  %3938 = vmatmul.mubr.msk.bf16.gmra.mxu1 %vm1493_vm1, %v1431_v24  ;;  %v4118_v24 = vld [vmem:[%s5382_s5 + $0x20] ss:$8 sps:$4 sm:$0xff]  }
 0x11d   : > { %v1187_v30 = vadd.f32 %v4483_v11, %v1186_v29  ;;  %v1381_v31 = vmax.f32 %v1195_v27, 0.0  ;;  %2094 = vmatpush1.bf16.msra.mxu0 %v4118_v24  ;;  %4018 = vmatpush1.bf16.msra.mxu1 %v4118_v24 }
 0x11e   : > { %v3875_v32 = vpop.f32.mrf.mxu0 }
 0x11f   : > { %v1379_v34 = vmax.f32 %v1187_v30, 0.0  ;;  %v1433_v38 = vpack.c.bf16 %v1381_v31, %v1380_v35  ;;  %v1208_v42 = vadd.f32 %v3875_v32, %v4483_v11  ;;  %v4123_v30 = vld [vmem:[%s5382_s5 + $0x14] ss:$8 sps:$4 sm:$0xff]  }
 0x120   : > { %v1199_v36 = vpop.f32.mrf.mxu0  ;;  %2095 = vmatprep.subr.bf16.mxu0 %v4123_v30  ;;  %4011 = vmatprep.subr.bf16.mxu1 %v4123_v30 }
 0x121   : > { %v1432_v37 = vpack.c.bf16 %v1379_v34, %v1378_v33  ;;  %v1200_v40 = vadd.f32 %v4483_v11, %v1199_v36  ;;  %v1384_v49 = vmax.f32 %v1208_v42, 0.0  ;;  %v4121_v34 = vld [vmem:[%s5382_s5 + $0x10] ss:$8 sps:$4 sm:$0xff]  }
 0x122   : > { %v3876_v39 = vpop.f32.mrf.mxu0  ;;  %2096 = vmatpush1.bf16.msra.mxu0 %v4121_v34  ;;  %4019 = vmatpush1.bf16.msra.mxu1 %v4121_v34 }
 0x123   : > { %v1211_v41 = vadd.f32 %v3876_v39, %v4483_v11  ;;  %3941 = vmatprep.mubr.msk.bf16.mxu1 %vm1493_vm1, %v1432_v37  ;;  %v1382_v47 = vmax.f32 %v1200_v40, 0.0  ;;  %v4126_v40 = vld [vmem:[%s5382_s5 + $0x4] ss:$8 sps:$4 sm:$0xff]  }
 0x124   : > { %v1202_v43 = vpop.f32.mrf.mxu0  ;;  %3942 = vmatmul.mubr.msk.bf16.gmra.mxu1 %vm1493_vm1, %v1433_v38  ;;  %2097 = vmatprep.subr.bf16.mxu0 %v4126_v40 }
 0x125   : > { %v1203_v44 = vadd.f32 %v4483_v11, %v1202_v43  ;;  %v1385_v45 = vmax.f32 %v1211_v41, 0.0  ;;  %v4124_v43 = vld [vmem:[%s5382_s5] ss:$8 sps:$4 sm:$0xff]   ;;  %4012 = vmatprep.subr.bf16.mxu1 %v4126_v40 }
 0x126   : > { %v3879_v46 = vpop.f32.mrf.mxu0  ;;  %2098 = vmatpush1.bf16.msra.mxu0 %v4124_v43  ;;  %4020 = vmatpush1.bf16.msra.mxu1 %v4124_v43 }
 0x127   : > { %v1383_v48 = vmax.f32 %v1203_v44, 0.0  ;;  %v1435_v52 = vpack.c.bf16 %v1385_v45, %v1384_v49  ;;  %v1224_v56 = vadd.f32 %v3879_v46, %v4483_v11 }
 0x128   : > { %v1215_v50 = vpop.f32.mrf.mxu0 }
 0x129   : > { %v1434_v51 = vpack.c.bf16 %v1383_v48, %v1382_v47  ;;  %v1216_v54 = vadd.f32 %v4483_v11, %v1215_v50  ;;  %v1388_v63 = vmax.f32 %v1224_v56, 0.0 }
 0x12a   : > { %v3880_v53 = vpop.f32.mrf.mxu0 }
 0x12b   : > { %v1227_v55 = vadd.f32 %v3880_v53, %v4483_v11  ;;  %3945 = vmatprep.mubr.msk.bf16.mxu1 %vm1493_vm1, %v1434_v51  ;;  %v1386_v61 = vmax.f32 %v1216_v54, 0.0 }
 0x12c   : > { %v1218_v57 = vpop.f32.mrf.mxu0  ;;  %3946 = vmatmul.mubr.msk.bf16.gmra.mxu1 %vm1493_vm1, %v1435_v52  ;;  %v4203_v52 = vmov 0  }
 0x12d   : > { %v1219_v58 = vadd.f32 %v4483_v11, %v1218_v57  ;;  %v1389_v59 = vmax.f32 %v1227_v55, 0.0  ;;  %2115 = vmatprep.mubr.bf16.mxu0 %v4203_v52 }
 0x12e   : > { %v3883_v60 = vpop.f32.mrf.mxu0 }
 0x12f   : > { %v1387_v62 = vmax.f32 %v1219_v58, 0.0  ;;  %v1437_v2 = vpack.c.bf16 %v1389_v59, %v1388_v63  ;;  %v1240_v6 = vadd.f32 %v3883_v60, %v4483_v11 }
 0x130   : > { %v1231_v0 = vpop.f32.mrf.mxu0 }
 0x131   : > { %v1436_v1 = vpack.c.bf16 %v1387_v62, %v1386_v61  ;;  %v1232_v4 = vadd.f32 %v4483_v11, %v1231_v0  ;;  %v1392_v14 = vmax.f32 %v1240_v6, 0.0 }
 0x132   : > { %v3884_v3 = vpop.f32.mrf.mxu0 }
 0x133   : > { %v1243_v5 = vadd.f32 %v3884_v3, %v4483_v11  ;;  %3949 = vmatprep.mubr.msk.bf16.mxu1 %vm1493_vm1, %v1436_v1  ;;  %v1390_v12 = vmax.f32 %v1232_v4, 0.0 }
 0x134   : > { %v1234_v7 = vpop.f32.mrf.mxu0  ;;  %3950 = vmatmul.mubr.msk.bf16.gmra.mxu1 %vm1493_vm1, %v1437_v2 }
 0x135   : > { %v1235_v8 = vadd.f32 %v4483_v11, %v1234_v7  ;;  %v1393_v9 = vmax.f32 %v1243_v5, 0.0 }
 0x136   : > { %v3887_v10 = vpop.f32.mrf.mxu0 }
 0x137   : > { %v1391_v13 = vmax.f32 %v1235_v8, 0.0  ;;  %v1439_v17 = vpack.c.bf16 %v1393_v9, %v1392_v14  ;;  %v1256_v22 = vadd.f32 %v3887_v10, %v4483_v11 }
 0x138   : > { %v1247_v15 = vpop.f32.mrf.mxu0 }
 0x139   : > { %v1438_v16 = vpack.c.bf16 %v1391_v13, %v1390_v12  ;;  %v1248_v19 = vadd.f32 %v4483_v11, %v1247_v15  ;;  %v1396_v31 = vmax.f32 %v1256_v22, 0.0 }
 0x13a   : > { %v3888_v18 = vpop.f32.mrf.mxu0 }
 0x13b   : > { %v1259_v20 = vadd.f32 %v3888_v18, %v4483_v11  ;;  %3953 = vmatprep.mubr.msk.bf16.mxu1 %vm1493_vm1, %v1438_v16  ;;  %v1394_v28 = vmax.f32 %v1248_v19, 0.0 }
 0x13c   : > { %v1250_v23 = vpop.f32.mrf.mxu0  ;;  %3954 = vmatmul.mubr.msk.bf16.gmra.mxu1 %vm1493_vm1, %v1439_v17 }
 0x13d   : > { %v1251_v25 = vadd.f32 %v4483_v11, %v1250_v23  ;;  %v1397_v26 = vmax.f32 %v1259_v20, 0.0 }
 0x13e   : > { %v3891_v27 = vpop.f32.mrf.mxu0 }
 0x13f   : > { %v1395_v29 = vmax.f32 %v1251_v25, 0.0  ;;  %v1272_v32 = vadd.f32 %v3891_v27, %v4483_v11  ;;  %v1441_v37 = vpack.c.bf16 %v1397_v26, %v1396_v31 }
 0x140   : > { %v1263_v33 = vpop.f32.mrf.mxu0 }
 0x141   : > { %v1440_v35 = vpack.c.bf16 %v1395_v29, %v1394_v28  ;;  %v1264_v36 = vadd.f32 %v4483_v11, %v1263_v33  ;;  %v1400_v41 = vmax.f32 %v1272_v32, 0.0 }
 0x142   : > { %v3892_v38 = vpop.f32.mrf.mxu0 }
 0x143   : > { %v1275_v39 = vadd.f32 %v3892_v38, %v4483_v11  ;;  %3957 = vmatprep.mubr.msk.bf16.mxu1 %vm1493_vm1, %v1440_v35  ;;  %v1398_v44 = vmax.f32 %v1264_v36, 0.0 }
 0x144   : > { %v1266_v42 = vpop.f32.mrf.mxu0  ;;  %3958 = vmatmul.mubr.msk.bf16.gmra.mxu1 %vm1493_vm1, %v1441_v37 }
 0x145   : > { %v1401_v45 = vmax.f32 %v1275_v39, 0.0  ;;  %v1267_v46 = vadd.f32 %v4483_v11, %v1266_v42 }
 0x146   : > { %v3895_v47 = vpop.f32.mrf.mxu0 }
 0x147   : > { %v1399_v48 = vmax.f32 %v1267_v46, 0.0  ;;  %v1443_v49 = vpack.c.bf16 %v1401_v45, %v1400_v41  ;;  %v1288_v50 = vadd.f32 %v3895_v47, %v4483_v11 }
 0x148   : > { %v1279_v51 = vpop.f32.mrf.mxu0 }
 0x149   : > { %v1442_v53 = vpack.c.bf16 %v1399_v48, %v1398_v44  ;;  %v1280_v54 = vadd.f32 %v4483_v11, %v1279_v51  ;;  %v1404_v57 = vmax.f32 %v1288_v50, 0.0 }
 0x14a   : > { %v3896_v55 = vpop.f32.mrf.mxu0 }
 0x14b   : > { %3961 = vmatprep.mubr.msk.bf16.mxu1 %vm1493_vm1, %v1442_v53  ;;  %v1291_v56 = vadd.f32 %v3896_v55, %v4483_v11  ;;  %v1402_v59 = vmax.f32 %v1280_v54, 0.0 }
 0x14c   : > { %3962 = vmatmul.mubr.msk.bf16.gmra.mxu1 %vm1493_vm1, %v1443_v49  ;;  %v1282_v58 = vpop.f32.mrf.mxu0 }
 0x14d   : > { %v1405_v60 = vmax.f32 %v1291_v56, 0.0  ;;  %v1283_v61 = vadd.f32 %v4483_v11, %v1282_v58 }
 0x14e   : > { %v3899_v62 = vpop.f32.mrf.mxu0 }
 0x14f   : > { %v1403_v63 = vmax.f32 %v1283_v61, 0.0  ;;  %v1445_v0 = vpack.c.bf16 %v1405_v60, %v1404_v57  ;;  %v1304_v1 = vadd.f32 %v3899_v62, %v4483_v11  ;;  %v4622_v61 = vld [vmem:[%s5381_s4] ss:$0 sm:$0xff] }
 0x150   : > { %v1295_v2 = vpop.f32.mrf.mxu0 }
 0x151   : > { %v1444_v3 = vpack.c.bf16 %v1403_v63, %v1402_v59  ;;  %v1296_v4 = vadd.f32 %v4483_v11, %v1295_v2  ;;  %v1408_v7 = vmax.f32 %v1304_v1, 0.0 }
 0x152   : > { %v3900_v5 = vpop.f32.mrf.mxu0 }
 0x153   : > { %3965 = vmatprep.mubr.msk.bf16.mxu1 %vm1493_vm1, %v1444_v3  ;;  %v1307_v6 = vadd.f32 %v3900_v5, %v4483_v11  ;;  %v1406_v9 = vmax.f32 %v1296_v4, 0.0 }
 0x154   : > { %3966 = vmatmul.mubr.msk.bf16.gmra.mxu1 %vm1493_vm1, %v1445_v0  ;;  %v1298_v8 = vpop.f32.mrf.mxu0 }
 0x155   : > { %v1409_v10 = vmax.f32 %v1307_v6, 0.0  ;;  %v1299_v12 = vadd.f32 %v4483_v11, %v1298_v8 }
 0x156   : > { %v3903_v13 = vpop.f32.mrf.mxu0 }
 0x157   : > { %v1407_v14 = vmax.f32 %v1299_v12, 0.0  ;;  %v1447_v15 = vpack.c.bf16 %v1409_v10, %v1408_v7  ;;  %v1320_v16 = vadd.f32 %v3903_v13, %v4483_v11 }
 0x158   : > { %v1311_v17 = vpop.f32.mrf.mxu0 }
 0x159   : > { %v1446_v18 = vpack.c.bf16 %v1407_v14, %v1406_v9  ;;  %v1312_v19 = vadd.f32 %v4483_v11, %v1311_v17  ;;  %v1412_v22 = vmax.f32 %v1320_v16, 0.0 }
 0x15a   : > { %v3904_v20 = vpop.f32.mrf.mxu0 }
 0x15b   : > { %3969 = vmatprep.mubr.msk.bf16.mxu1 %vm1493_vm1, %v1446_v18  ;;  %v1323_v21 = vadd.f32 %v3904_v20, %v4483_v11  ;;  %v1410_v24 = vmax.f32 %v1312_v19, 0.0 }
 0x15c   : > { %3970 = vmatmul.mubr.msk.bf16.gmra.mxu1 %vm1493_vm1, %v1447_v15  ;;  %v1314_v23 = vpop.f32.mrf.mxu0 }
 0x15d   : > { %v1413_v25 = vmax.f32 %v1323_v21, 0.0  ;;  %v1315_v26 = vadd.f32 %v4483_v11, %v1314_v23 }
 0x15e   : > { %v3907_v27 = vpop.f32.mrf.mxu0 }
 0x15f   : > { %v1411_v28 = vmax.f32 %v1315_v26, 0.0  ;;  %v1449_v29 = vpack.c.bf16 %v1413_v25, %v1412_v22  ;;  %v1336_v30 = vadd.f32 %v3907_v27, %v4483_v11 }
 0x160   : > { %v1327_v31 = vpop.f32.mrf.mxu0 }
 0x161   : > { %v1448_v32 = vpack.c.bf16 %v1411_v28, %v1410_v24  ;;  %v1328_v33 = vadd.f32 %v4483_v11, %v1327_v31  ;;  %v1416_v36 = vmax.f32 %v1336_v30, 0.0 }
 0x162   : > { %v3908_v34 = vpop.f32.mrf.mxu0 }
 0x163   : > { %3973 = vmatprep.mubr.msk.bf16.mxu1 %vm1493_vm1, %v1448_v32  ;;  %v1339_v35 = vadd.f32 %v3908_v34, %v4483_v11  ;;  %v1414_v38 = vmax.f32 %v1328_v33, 0.0 }
 0x164   : > { %3974 = vmatmul.mubr.msk.bf16.gmra.mxu1 %vm1493_vm1, %v1449_v29  ;;  %v1330_v37 = vpop.f32.mrf.mxu0 }
 0x165   : > { %v1417_v39 = vmax.f32 %v1339_v35, 0.0  ;;  %v1331_v40 = vadd.f32 %v4483_v11, %v1330_v37 }
 0x166   : > { %v3911_v41 = vpop.f32.mrf.mxu0 }
 0x167   : > { %v1415_v42 = vmax.f32 %v1331_v40, 0.0  ;;  %v1451_v43 = vpack.c.bf16 %v1417_v39, %v1416_v36  ;;  %v1352_v44 = vadd.f32 %v3911_v41, %v4483_v11 }
 0x168   : > { %v1343_v45 = vpop.f32.mrf.mxu0 }
 0x169   : > { %v1450_v46 = vpack.c.bf16 %v1415_v42, %v1414_v38  ;;  %v1344_v47 = vadd.f32 %v4483_v11, %v1343_v45  ;;  %v1420_v50 = vmax.f32 %v1352_v44, 0.0 }
 0x16a   : > { %v3912_v48 = vpop.f32.mrf.mxu0 }
 0x16b   : > { %3977 = vmatprep.mubr.msk.bf16.mxu1 %vm1493_vm1, %v1450_v46  ;;  %v1355_v49 = vadd.f32 %v3912_v48, %v4483_v11  ;;  %v1418_v53 = vmax.f32 %v1344_v47, 0.0 }
 0x16c   : > { %3978 = vmatmul.mubr.msk.bf16.gmra.mxu1 %vm1493_vm1, %v1451_v43  ;;  %v1346_v51 = vpop.f32.mrf.mxu0 }
 0x16d   : > { %v1421_v54 = vmax.f32 %v1355_v49, 0.0  ;;  %v1347_v55 = vadd.f32 %v4483_v11, %v1346_v51 }
 0x16f   : > { %v1419_v56 = vmax.f32 %v1347_v55, 0.0  ;;  %v1453_v57 = vpack.c.bf16 %v1421_v54, %v1420_v50 }
 0x171   : > { %v1452_v58 = vpack.c.bf16 %v1419_v56, %v1418_v53 }
 0x173   : > { %3981 = vmatprep.mubr.msk.bf16.mxu1 %vm1493_vm1, %v1452_v58 }
 0x174   : > { %3982 = vmatmul.mubr.msk.bf16.gmra.mxu1 %vm1493_vm1, %v1453_v57 }
 0x175   : > { %2285 = vmatprep.mubr.bf16.mxu1 %v4203_v52 }
 0x1bc   : > { %v3923_v59 = vpop.f32.mrf.mxu1 }
 0x1bd   : > { %v1633_v8 = vadd.f32 %v3923_v59, %v4622_v61 }
 0x1be   : > { %v1624_v60 = vpop.f32.mrf.mxu1 }
 0x1bf   : > { %v1625_v63 = vadd.f32 %v4622_v61, %v1624_v60  ;;  %v1881_v13 = vmax.f32 %v1633_v8, 0.0 }
 0x1c0   : > { %v3924_v62 = vpop.f32.mrf.mxu1 }
 0x1c1   : > { %v1879_v2 = vmax.f32 %v1625_v63, 0.0  ;;  %v1636_v5 = vadd.f32 %v3924_v62, %v4622_v61 }
 0x1c2   : > { %v1627_v11 = vpop.f32.mrf.mxu1 }
 0x1c3   : > { %v1628_v0 = vadd.f32 %v4622_v61, %v1627_v11  ;;  %v1882_v10 = vmax.f32 %v1636_v5, 0.0 }
 0x1c4   : > { %v3927_v1 = vpop.f32.mrf.mxu1 }
 0x1c5   : > { %v1880_v3 = vmax.f32 %v1628_v0, 0.0  ;;  %v1944_v15 = vpack.c.bf16 %v1882_v10, %v1881_v13  ;;  %v1649_v27 = vadd.f32 %v3927_v1, %v4622_v61 }
 0x1c6   : > { %v1640_v4 = vpop.f32.mrf.mxu1 }
 0x1c7   : > { %v1943_v6 = vpack.c.bf16 %v1880_v3, %v1879_v2  ;;  %v1641_v18 = vadd.f32 %v4622_v61, %v1640_v4  ;;  %v1885_v31 = vmax.f32 %v1649_v27, 0.0 }
 0x1c8   : > { %v3928_v7 = vpop.f32.mrf.mxu1 }
 0x1c9   : > { %2116 = vmatmul.mubr.bf16.vlgmr.msra.gmra.mxu0 %v1943_v6  ;;  %v1883_v22 = vmax.f32 %v1641_v18, 0.0  ;;  %v1652_v24 = vadd.f32 %v3928_v7, %v4622_v61 }
 0x1ca   : > { %v1643_v9 = vpop.f32.mrf.mxu1  ;;  %2125 = vmatprep.mubr.bf16.mxu0 %v4203_v52 }
 0x1cb   : > { %v1644_v16 = vadd.f32 %v4622_v61, %v1643_v9  ;;  %v1886_v29 = vmax.f32 %v1652_v24, 0.0 }
 0x1cc   : > { %v3931_v12 = vpop.f32.mrf.mxu1 }
 0x1cd   : > { %v1884_v20 = vmax.f32 %v1644_v16, 0.0  ;;  %v1946_v33 = vpack.c.bf16 %v1886_v29, %v1885_v31  ;;  %v1665_v45 = vadd.f32 %v3931_v12, %v4622_v61 }
 0x1ce   : > { %v1656_v14 = vpop.f32.mrf.mxu1 }
 0x1cf   : > { %v1945_v25 = vpack.c.bf16 %v1884_v20, %v1883_v22  ;;  %v1657_v36 = vadd.f32 %v4622_v61, %v1656_v14  ;;  %v1889_v49 = vmax.f32 %v1665_v45, 0.0 }
 0x1d0   : > { %v3932_v17 = vpop.f32.mrf.mxu1 }
 0x1d1   : > { %2126 = vmatmul.mubr.bf16.gmra.mxu0 %v1944_v15  ;;  %v1887_v40 = vmax.f32 %v1657_v36, 0.0  ;;  %v1668_v42 = vadd.f32 %v3932_v17, %v4622_v61 }
 0x1d2   : > { %v1659_v19 = vpop.f32.mrf.mxu1  ;;  %2135 = vmatprep.mubr.bf16.mxu0 %v4203_v52 }
 0x1d3   : > { %v1660_v34 = vadd.f32 %v4622_v61, %v1659_v19  ;;  %v1890_v47 = vmax.f32 %v1668_v42, 0.0 }
 0x1d4   : > { %v3935_v21 = vpop.f32.mrf.mxu1 }
 0x1d5   : > { %v1888_v38 = vmax.f32 %v1660_v34, 0.0  ;;  %v1948_v51 = vpack.c.bf16 %v1890_v47, %v1889_v49  ;;  %v1681_v1 = vadd.f32 %v3935_v21, %v4622_v61 }
 0x1d6   : > { %v1672_v23 = vpop.f32.mrf.mxu1 }
 0x1d7   : > { %v1947_v43 = vpack.c.bf16 %v1888_v38, %v1887_v40  ;;  %v1673_v55 = vadd.f32 %v4622_v61, %v1672_v23  ;;  %v1893_v8 = vmax.f32 %v1681_v1, 0.0 }
 0x1d8   : > { %v3936_v26 = vpop.f32.mrf.mxu1 }
 0x1d9   : > { %2136 = vmatmul.mubr.bf16.gmra.mxu0 %v1945_v25  ;;  %v1891_v59 = vmax.f32 %v1673_v55, 0.0  ;;  %v1684_v62 = vadd.f32 %v3936_v26, %v4622_v61 }
 0x1da   : > { %v1675_v28 = vpop.f32.mrf.mxu1  ;;  %2145 = vmatprep.mubr.bf16.mxu0 %v4203_v52 }
 0x1db   : > { %v1676_v53 = vadd.f32 %v4622_v61, %v1675_v28  ;;  %v1894_v4 = vmax.f32 %v1684_v62, 0.0 }
 0x1dc   : > { %v4635_v30 = vpop.f32.mrf.mxu1 }
 0x1dd   : > { %v1892_v57 = vmax.f32 %v1676_v53, 0.0  ;;  %v1950_v12 = vpack.c.bf16 %v1894_v4, %v1893_v8  ;;  %v1697_v36 = vadd.f32 %v4635_v30, %v4622_v61 }
 0x1de   : > { %v1688_v32 = vpop.f32.mrf.mxu1 }
 0x1df   : > { %v1949_v63 = vpack.c.bf16 %v1892_v57, %v1891_v59  ;;  %v1689_v16 = vadd.f32 %v4622_v61, %v1688_v32 }
 0x1e0   : > { %v4638_v35 = vpop.f32.mrf.mxu1 }
 0x1e1   : > { %2146 = vmatmul.mubr.bf16.gmra.mxu0 %v1946_v33  ;;  %v1895_v25 = vmax.f32 %v1689_v16, 0.0  ;;  %v1700_v31 = vadd.f32 %v4638_v35, %v4622_v61 }
 0x1e2   : > { %v1691_v37 = vpop.f32.mrf.mxu1  ;;  %2155 = vmatprep.mubr.bf16.mxu0 %v4203_v52 }
 0x1e3   : > { %v1692_v13 = vadd.f32 %v4622_v61, %v1691_v37  ;;  %v1898_v40 = vmax.f32 %v1700_v31, 0.0 }
 0x1e4   : > { %v4642_v39 = vpop.f32.mrf.mxu1 }
 0x1e5   : > { %v1896_v20 = vmax.f32 %v1692_v13, 0.0 }
 0x1e6   : > { %v4644_v41 = vpop.f32.mrf.mxu1 }
 0x1e7   : > { %v1951_v32 = vpack.c.bf16 %v1896_v20, %v1895_v25 }
 0x1e8   : > { %v4647_v44 = vpop.f32.mrf.mxu1 }
 0x1e9   : > { %2156 = vmatmul.mubr.bf16.gmra.mxu0 %v1947_v43  ;;  %v1897_v43 = vmax.f32 %v1697_v36, 0.0  ;;  %v1716_v1 = vadd.f32 %v4647_v44, %v4622_v61 }
 0x1ea   : > { %v4650_v46 = vpop.f32.mrf.mxu1  ;;  %2165 = vmatprep.mubr.bf16.mxu0 %v4203_v52 }
 0x1eb   : > { %v1708_v53 = vadd.f32 %v4622_v61, %v4650_v46  ;;  %v1902_v8 = vmax.f32 %v1716_v1, 0.0 }
 0x1ec   : > { %v4653_v48 = vpop.f32.mrf.mxu1 }
 0x1ed   : > { %v1900_v62 = vmax.f32 %v1708_v53, 0.0 }
 0x1ee   : > { %v4655_v50 = vpop.f32.mrf.mxu1 }
 0x1f0   : > { %v4658_v54 = vpop.f32.mrf.mxu1 }
 0x1f1   : > { %2166 = vmatmul.mubr.bf16.gmra.mxu0 %v1948_v51  ;;  %v1952_v51 = vpack.c.bf16 %v1898_v40, %v1897_v43 }
 0x1f2   : > { %v4661_v56 = vpop.f32.mrf.mxu1  ;;  %2175 = vmatprep.mubr.bf16.mxu0 %v4203_v52 }
 0x1f4   : > { %v3951_v58 = vpop.f32.mrf.mxu1 }
 0x1f5   : > { %v1745_v11 = vadd.f32 %v3951_v58, %v4622_v61  ;;  %v1705_v58 = vadd.f32 %v4622_v61, %v4644_v41 }
 0x1f6   : > { %v4664_v60 = vpop.f32.mrf.mxu1 }
 0x1f7   : > { %v1909_v5 = vmax.f32 %v1745_v11, 0.0  ;;  %v1737_v43 = vadd.f32 %v4622_v61, %v4664_v60 }
 0x1f8   : > { %v3952_v0 = vpop.f32.mrf.mxu1 }
 0x1f9   : > { %v1748_v2 = vadd.f32 %v3952_v0, %v4622_v61  ;;  %2176 = vmatmul.mubr.bf16.gmra.mxu0 %v1949_v63  ;;  %v1899_v0 = vmax.f32 %v1705_v58, 0.0 }
 0x1fa   : > { %v4670_v3 = vpop.f32.mrf.mxu1  ;;  %2185 = vmatprep.mubr.bf16.mxu0 %v4203_v52 }
 0x1fb   : > { %v1910_v6 = vmax.f32 %v1748_v2, 0.0  ;;  %v1953_v2 = vpack.c.bf16 %v1900_v62, %v1899_v0 }
 0x1fc   : > { %v3955_v7 = vpop.f32.mrf.mxu1 }
 0x1fd   : > { %v4673_v9 = vpack.c.bf16 %v1910_v6, %v1909_v5  ;;  %v1761_v14 = vadd.f32 %v3955_v7, %v4622_v61  ;;  %v1713_v6 = vadd.f32 %v4642_v39, %v4622_v61 }
 0x1fe   : > { %v1752_v10 = vpop.f32.mrf.mxu1 }
 0x1ff   : > { %v1753_v17 = vadd.f32 %v4622_v61, %v1752_v10  ;;  %v1913_v21 = vmax.f32 %v1761_v14, 0.0  ;;  %v1901_v44 = vmax.f32 %v1713_v6, 0.0 }
 0x200   : > { %v3956_v15 = vpop.f32.mrf.mxu1 }
 0x201   : > { %v1764_v18 = vadd.f32 %v3956_v15, %v4622_v61  ;;  %2186 = vmatmul.mubr.bf16.gmra.mxu0 %v1950_v12  ;;  %v1911_v26 = vmax.f32 %v1753_v17, 0.0  ;;  %v1954_v14 = vpack.c.bf16 %v1902_v8, %v1901_v44  ;;  %v1724_v15 = vadd.f32 %v4622_v61, %v4661_v56 }
 0x202   : > { %v1755_v19 = vpop.f32.mrf.mxu1  ;;  %2195 = vmatprep.mubr.bf16.mxu0 %v4203_v52 }
 0x203   : > { %v1914_v22 = vmax.f32 %v1764_v18, 0.0  ;;  %v1756_v23 = vadd.f32 %v4622_v61, %v1755_v19  ;;  %v1721_v18 = vadd.f32 %v4622_v61, %v4655_v50  ;;  %v1904_v20 = vmax.f32 %v1724_v15, 0.0 }
 0x204   : > { %v3959_v24 = vpop.f32.mrf.mxu1 }
 0x205   : > { %v1960_v27 = vpack.c.bf16 %v1914_v22, %v1913_v21  ;;  %v1912_v28 = vmax.f32 %v1756_v23, 0.0  ;;  %v1777_v59 = vadd.f32 %v3959_v24, %v4622_v61  ;;  %v1903_v23 = vmax.f32 %v1721_v18, 0.0 }
 0x206   : > { %v1768_v29 = vpop.f32.mrf.mxu1  ;;  %v1732_v24 = vadd.f32 %v4658_v54, %v4622_v61 }
 0x207   : > { %v4684_v33 = vpack.c.bf16 %v1912_v28, %v1911_v26  ;;  %2286 = vmatmul.mubr.bf16.vlgmr.msra.gmra.mxu1 %v1960_v27  ;;  %v1769_v37 = vadd.f32 %v4622_v61, %v1768_v29  ;;  %v1917_v46 = vmax.f32 %v1777_v59, 0.0  ;;  %v1955_v25 = vpack.c.bf16 %v1904_v20, %v1903_v23 }
 0x208   : > { %v3960_v34 = vpop.f32.mrf.mxu1  ;;  %2295 = vmatprep.mubr.bf16.mxu1 %v4203_v52  ;;  %v1729_v28 = vadd.f32 %v4653_v48, %v4622_v61  ;;  %v1906_v31 = vmax.f32 %v1732_v24, 0.0 }
 0x209   : > { %2196 = vmatmul.mubr.bf16.gmra.mxu0 %v1951_v32  ;;  %v1915_v45 = vmax.f32 %v1769_v37, 0.0  ;;  %v1780_v30 = vadd.f32 %v3960_v34, %v4622_v61 }
 0x20a   : > { %v1771_v38 = vpop.f32.mrf.mxu1  ;;  %2205 = vmatprep.mubr.bf16.mxu0 %v4203_v52  ;;  %v1905_v54 = vmax.f32 %v1729_v28, 0.0 }
 0x20b   : > { %v1772_v42 = vadd.f32 %v4622_v61, %v1771_v38  ;;  %v1918_v63 = vmax.f32 %v1780_v30, 0.0  ;;  %v1740_v38 = vadd.f32 %v4622_v61, %v4670_v3  ;;  %v1907_v3 = vmax.f32 %v1737_v43, 0.0 }
 0x20c   : > { %v3963_v35 = vpop.f32.mrf.mxu1  ;;  %v1956_v37 = vpack.c.bf16 %v1906_v31, %v1905_v54 }
 0x20d   : > { %v1916_v47 = vmax.f32 %v1772_v42, 0.0  ;;  %v1962_v4 = vpack.c.bf16 %v1918_v63, %v1917_v46  ;;  %v1793_v19 = vadd.f32 %v3963_v35, %v4622_v61 }
 0x20e   : > { %v1784_v49 = vpop.f32.mrf.mxu1 }
 0x20f   : > { %v1961_v55 = vpack.c.bf16 %v1916_v47, %v1915_v45  ;;  %v1785_v7 = vadd.f32 %v4622_v61, %v1784_v49  ;;  %v1921_v56 = vmax.f32 %v1793_v19, 0.0  ;;  %v1908_v45 = vmax.f32 %v1740_v38, 0.0 }
 0x210   : > { %v3964_v57 = vpop.f32.mrf.mxu1 }
 0x211   : > { %2206 = vmatmul.mubr.bf16.gmra.mxu0 %v1952_v51  ;;  %2296 = vmatmul.mubr.bf16.gmra.mxu1 %v1961_v55  ;;  %v1919_v13 = vmax.f32 %v1785_v7, 0.0  ;;  %v1796_v16 = vadd.f32 %v3964_v57, %v4622_v61  ;;  %v1957_v53 = vpack.c.bf16 %v1908_v45, %v1907_v3  ;;  %v1991_v45 = vld [vmem:[%s5383_s6] sm:$0x3] }
 0x212   : > { %2215 = vmatprep.mubr.bf16.mxu0 %v4203_v52  ;;  %2305 = vmatprep.mubr.bf16.mxu1 %v4203_v52  ;;  %v1787_v11 = vpop.f32.mrf.mxu1 }
 0x213   : > { %v1788_v41 = vadd.f32 %v4622_v61, %v1787_v11  ;;  %v1922_v21 = vmax.f32 %v1796_v16, 0.0 }
 0x214   : > { %v3967_v5 = vpop.f32.mrf.mxu1 }
 0x215   : > { %v1920_v10 = vmax.f32 %v1788_v41, 0.0  ;;  %v1964_v26 = vpack.c.bf16 %v1922_v21, %v1921_v56  ;;  %v1809_v40 = vadd.f32 %v3967_v5, %v4622_v61 }
 0x216   : > { %v1800_v12 = vpop.f32.mrf.mxu1 }
 0x217   : > { %v1963_v39 = vpack.c.bf16 %v1920_v10, %v1919_v13  ;;  %v1801_v50 = vadd.f32 %v4622_v61, %v1800_v12  ;;  %v1925_v47 = vmax.f32 %v1809_v40, 0.0 }
 0x218   : > { %v3968_v17 = vpop.f32.mrf.mxu1 }
 0x219   : > { %2216 = vmatmul.mubr.bf16.gmra.mxu0 %v1953_v2  ;;  %2306 = vmatmul.mubr.bf16.gmra.mxu1 %v1962_v4  ;;  %v1923_v32 = vmax.f32 %v1801_v50, 0.0  ;;  %v1812_v48 = vadd.f32 %v3968_v17, %v4622_v61 }
 0x21a   : > { %2225 = vmatprep.mubr.bf16.mxu0 %v4203_v52  ;;  %2315 = vmatprep.mubr.bf16.mxu1 %v4203_v52  ;;  %v1803_v22 = vpop.f32.mrf.mxu1 }
 0x21b   : > { %v1804_v27 = vadd.f32 %v4622_v61, %v1803_v22  ;;  %v1926_v49 = vmax.f32 %v1812_v48, 0.0 }
 0x21c   : > { %v3971_v29 = vpop.f32.mrf.mxu1 }
 0x21d   : > { %v1924_v34 = vmax.f32 %v1804_v27, 0.0  ;;  %v1966_v30 = vpack.c.bf16 %v1926_v49, %v1925_v47  ;;  %v1825_v63 = vadd.f32 %v3971_v29, %v4622_v61 }
 0x21e   : > { %v1816_v36 = vpop.f32.mrf.mxu1 }
 0x21f   : > { %v1965_v42 = vpack.c.bf16 %v1924_v34, %v1923_v32  ;;  %v1817_v55 = vadd.f32 %v4622_v61, %v1816_v36  ;;  %v1929_v1 = vmax.f32 %v1825_v63, 0.0 }
 0x220   : > { %v3972_v35 = vpop.f32.mrf.mxu1 }
 0x221   : > { %2226 = vmatmul.mubr.bf16.gmra.mxu0 %v1954_v14  ;;  %2316 = vmatmul.mubr.bf16.gmra.mxu1 %v1963_v39  ;;  %v1927_v60 = vmax.f32 %v1817_v55, 0.0  ;;  %v1828_v11 = vadd.f32 %v3972_v35, %v4622_v61 }
 0x222   : > { %2235 = vmatprep.mubr.bf16.mxu0 %v4203_v52  ;;  %2325 = vmatprep.mubr.bf16.mxu1 %v4203_v52  ;;  %v1819_v51 = vpop.f32.mrf.mxu1 }
 0x223   : > { %v1820_v57 = vadd.f32 %v4622_v61, %v1819_v51  ;;  %v1930_v2 = vmax.f32 %v1828_v11, 0.0 }
 0x224   : > { %v3975_v58 = vpop.f32.mrf.mxu1 }
 0x225   : > { %v1928_v59 = vmax.f32 %v1820_v57, 0.0  ;;  %v1968_v41 = vpack.c.bf16 %v1930_v2, %v1929_v1  ;;  %v1841_v12 = vadd.f32 %v3975_v58, %v4622_v61 }
 0x226   : > { %v1832_v62 = vpop.f32.mrf.mxu1 }
 0x227   : > { %v1967_v0 = vpack.c.bf16 %v1928_v59, %v1927_v60  ;;  %v1833_v5 = vadd.f32 %v4622_v61, %v1832_v62  ;;  %v1933_v15 = vmax.f32 %v1841_v12, 0.0 }
 0x228   : > { %v3976_v46 = vpop.f32.mrf.mxu1 }
 0x229   : > { %2236 = vmatmul.mubr.bf16.gmra.mxu0 %v1955_v25  ;;  %2326 = vmatmul.mubr.bf16.gmra.mxu1 %v1964_v26  ;;  %v1844_v44 = vadd.f32 %v3976_v46, %v4622_v61 }
 0x22a   : > { %2245 = vmatprep.mubr.bf16.mxu0 %v4203_v52  ;;  %2335 = vmatprep.mubr.bf16.mxu1 %v4203_v52  ;;  %v1835_v4 = vpop.f32.mrf.mxu1 }
 0x22b   : > { %v1836_v6 = vadd.f32 %v4622_v61, %v1835_v4  ;;  %v1934_v16 = vmax.f32 %v1844_v44, 0.0 }
 0x22c   : > { %v3979_v7 = vpop.f32.mrf.mxu1 }
 0x22d   : > { %v1932_v8 = vmax.f32 %v1836_v6, 0.0  ;;  %v1970_v17 = vpack.c.bf16 %v1934_v16, %v1933_v15  ;;  %v1857_v23 = vadd.f32 %v3979_v7, %v4622_v61 }
 0x22e   : > { %v1848_v10 = vpop.f32.mrf.mxu1 }
 0x22f   : > { %v1937_v26 = vmax.f32 %v1857_v23, 0.0 }
 0x230   : > { %v3980_v14 = vpop.f32.mrf.mxu1 }
 0x231   : > { %2246 = vmatmul.mubr.bf16.gmra.mxu0 %v1956_v37  ;;  %2336 = vmatmul.mubr.bf16.gmra.mxu1 %v1965_v42  ;;  %v1860_v56 = vadd.f32 %v3980_v14, %v4622_v61  ;;  %v1993_v42 = vlaneseq }
 0x232   : > { %2255 = vmatprep.mubr.bf16.mxu0 %v4203_v52  ;;  %2345 = vmatprep.mubr.bf16.mxu1 %v4203_v52  ;;  %v1851_v39 = vpop.f32.mrf.mxu1 }
 0x233   : > { %v1852_v18 = vadd.f32 %v4622_v61, %v1851_v39  ;;  %v1938_v50 = vmax.f32 %v1860_v56, 0.0  ;;  %v1994_v35 = vshrl.u32 %v1993_v42, 7 }
 0x234   : > { %v3983_v19 = vpop.f32.mrf.mxu1 }
 0x235   : > { %v1936_v21 = vmax.f32 %v1852_v18, 0.0  ;;  %v1972_v28 = vpack.c.bf16 %v1938_v50, %v1937_v26  ;;  %v1873_v54 = vadd.f32 %v3983_v19, %v4622_v61  ;;  %v1995_v43 = vsub.s32 0, %v1994_v35 }
 0x236   : > { %v1864_v22 = vpop.f32.mrf.mxu1  ;;  %v1999_v47 = vsub.s32 1, %v1994_v35 }
 0x237   : > { %v1865_v29 = vadd.f32 %v4622_v61, %v1864_v22  ;;  %v1941_v38 = vmax.f32 %v1873_v54, 0.0  ;;  %v4763_v49 = vrot.slane %v1991_v45, %v1995_v43 }
 0x238   : > { %v3984_v25 = vpop.f32.mrf.mxu1 }
 0x239   : > { %2256 = vmatmul.mubr.bf16.gmra.mxu0 %v1957_v53  ;;  %2346 = vmatmul.mubr.bf16.gmra.mxu1 %v1966_v30  ;;  %v1939_v32 = vmax.f32 %v1865_v29, 0.0  ;;  %v1876_v36 = vadd.f32 %v3984_v25, %v4622_v61 }
 0x23a   : > { %2265 = vmatprep.mubr.bf16.mxu0 %v4203_v52  ;;  %2355 = vmatprep.mubr.bf16.mxu1 %v4203_v52  ;;  %v1867_v27 = vpop.f32.mrf.mxu1 }
 0x23b   : > { %v1868_v31 = vadd.f32 %v4622_v61, %v1867_v27  ;;  %v1942_v40 = vmax.f32 %v1876_v36, 0.0 }
 0x23d   : > { %v1940_v34 = vmax.f32 %v1868_v31, 0.0  ;;  %v1974_v48 = vpack.c.bf16 %v1942_v40, %v1941_v38 }
 0x23f   : > { %v1973_v37 = vpack.c.bf16 %v1940_v34, %v1939_v32 }
 0x241   : > { %2266 = vmatmul.mubr.bf16.gmra.mxu0 %v4673_v9  ;;  %2356 = vmatmul.mubr.bf16.gmra.mxu1 %v1967_v0  ;;  %v1931_v9 = vmax.f32 %v1833_v5, 0.0 }
 0x242   : > { %2275 = vmatprep.mubr.bf16.mxu0 %v4203_v52  ;;  %2365 = vmatprep.mubr.bf16.mxu1 %v4203_v52 }
 0x243   : > { %v1969_v13 = vpack.c.bf16 %v1932_v8, %v1931_v9 }
 0x249   : > { %2276 = vmatmul.mubr.bf16.gmra.mxu0 %v4684_v33  ;;  %2366 = vmatmul.mubr.bf16.gmra.mxu1 %v1968_v41  ;;  %v1849_v33 = vadd.f32 %v4622_v61, %v1848_v10  ;;  %v4765_v61 = vrot.slane %v1991_v45, %v1999_v47 }
 0x24a   : > { %2375 = vmatprep.mubr.bf16.mxu1 %v4203_v52 }
 0x24b   : > { %v1935_v20 = vmax.f32 %v1849_v33, 0.0 }
 0x24d   : > { %v1971_v24 = vpack.c.bf16 %v1936_v21, %v1935_v20 }
 0x251   : > { %2376 = vmatmul.mubr.bf16.gmra.mxu1 %v1969_v13 }
 0x252   : > { %2385 = vmatprep.mubr.bf16.mxu1 %v4203_v52 }
 0x259   : > { %2386 = vmatmul.mubr.bf16.gmra.mxu1 %v1970_v17 }
 0x25a   : > { %2395 = vmatprep.mubr.bf16.mxu1 %v4203_v52 }
 0x261   : > { %2396 = vmatmul.mubr.bf16.gmra.mxu1 %v1971_v24 }
 0x262   : > { %2405 = vmatprep.mubr.bf16.mxu1 %v4203_v52 }
 0x269   : > { %2406 = vmatmul.mubr.bf16.gmra.mxu1 %v1972_v28 }
 0x26a   : > { %2415 = vmatprep.mubr.bf16.mxu1 %v4203_v52 }
 0x271   : > { %2416 = vmatmul.mubr.bf16.gmra.mxu1 %v1973_v37 }
 0x272   : > { %2425 = vmatprep.mubr.bf16.mxu1 %v4203_v52 }
 0x279   : > { %2426 = vmatmul.mubr.bf16.gmra.mxu1 %v1974_v48 }
 0x289   : > { %v2117_v51 = vpop.f32.mrf.mxu0 }
 0x28a   : > { %v2118_v52 = vadd.f32 %v2117_v51, %v4763_v49 }
 0x28b   : > { %v2119_v3 = vpop.f32.mrf.mxu0 }
 0x28c   : > { %v2120_v30 = vadd.f32 %v2119_v3, %v4765_v61  ;;  %v2436_v58 = vmax.f32 %v2118_v52, 0.0 }
 0x28d   : > { %v2121_v53 = vpop.f32.mrf.mxu0 }
 0x28e   : > { %v2122_v55 = vadd.f32 %v2121_v53, %v4763_v49  ;;  %v2437_v63 = vmax.f32 %v2120_v30, 0.0 }
 0x28f   : > { %v2123_v57 = vpop.f32.mrf.mxu0 }
 0x290   : > { %v2438_v60 = vmax.f32 %v2122_v55, 0.0  ;;  %v2124_v59 = vadd.f32 %v2123_v57, %v4765_v61 }
 0x291   : > { %v2127_v62 = vpop.f32.mrf.mxu0 }
 0x292   : > { %v2564_v11 = vpack.c.bf16 %v2438_v60, %v2436_v58  ;;  %v2439_v0 = vmax.f32 %v2124_v59, 0.0  ;;  %v2128_v2 = vadd.f32 %v2127_v62, %v4763_v49 }
 0x293   : > { %v2129_v46 = vpop.f32.mrf.mxu0 }
 0x294   : > { %v2565_v1 = vpack.c.bf16 %v2439_v0, %v2437_v63  ;;  %v2130_v41 = vadd.f32 %v2129_v46, %v4765_v61  ;;  %v2440_v7 = vmax.f32 %v2128_v2, 0.0 }
 0x295   : > { %v2131_v4 = vpop.f32.mrf.mxu0 }
 0x296   : > { %v2132_v5 = vadd.f32 %v2131_v4, %v4763_v49  ;;  %v2441_v12 = vmax.f32 %v2130_v41, 0.0 }
 0x297   : > { %v2133_v6 = vpop.f32.mrf.mxu0 }
 0x298   : > { %v2442_v9 = vmax.f32 %v2132_v5, 0.0  ;;  %v2134_v8 = vadd.f32 %v2133_v6, %v4765_v61 }
 0x299   : > { %v2137_v10 = vpop.f32.mrf.mxu0 }
 0x29a   : > { %v2566_v44 = vpack.c.bf16 %v2442_v9, %v2440_v7  ;;  %v2443_v13 = vmax.f32 %v2134_v8, 0.0  ;;  %v2138_v39 = vadd.f32 %v2137_v10, %v4763_v49 }
 0x29b   : > { %v2139_v14 = vpop.f32.mrf.mxu0 }
 0x29c   : > { %v2628_v15 = vmax.bf16 %v2566_v44, %v2564_v11  ;;  %v2567_v16 = vpack.c.bf16 %v2443_v13, %v2441_v12  ;;  %v2140_v20 = vadd.f32 %v2139_v14, %v4765_v61  ;;  %v2444_v26 = vmax.f32 %v2138_v39, 0.0 }
 0x29d   : > { %v2141_v17 = vpop.f32.mrf.mxu0 }
 0x29e   : > { %v2629_v33 = vunpack.i.l.bf16 %v2628_v15  ;;  %v2630_v18 = vunpack.i.h.bf16 %v2628_v15  ;;  %v2639_v19 = vmax.bf16 %v2567_v16, %v2565_v1  ;;  %v2142_v21 = vadd.f32 %v2141_v17, %v4763_v49 }
 0x29f   : > { %v2143_v22 = vpop.f32.mrf.mxu0  ;;  %v2445_v31 = vmax.f32 %v2140_v20, 0.0 }
 0x2a0   : > { %v2631_v23 = vmax.f32 %v2629_v33, %v2630_v18  ;;  %v2640_v56 = vunpack.i.l.bf16 %v2639_v19  ;;  %v2641_v24 = vunpack.i.h.bf16 %v2639_v19  ;;  %v2144_v25 = vadd.f32 %v2143_v22, %v4765_v61 }
 0x2a1   : > { %v2446_v50 = vmax.f32 %v2142_v21, 0.0  ;;  %v2147_v27 = vpop.f32.mrf.mxu0 }
 0x2a2   : > { %v2632_v28 = vrot.slane %v2631_v23, 4  ;;  %v2642_v29 = vmax.f32 %v2640_v56, %v2641_v24  ;;  %v2447_v32 = vmax.f32 %v2144_v25, 0.0  ;;  %v2148_v54 = vadd.f32 %v2147_v27, %v4763_v49 }
 0x2a3   : > { %v2568_v34 = vpack.c.bf16 %v2446_v50, %v2444_v26  ;;  %v2149_v36 = vpop.f32.mrf.mxu0 }
 0x2a4   : > { %v2633_v37 = vmax.f32 %v2631_v23, %v2632_v28  ;;  %v2643_v38 = vrot.slane %v2642_v29, 4  ;;  %v2569_v40 = vpack.c.bf16 %v2447_v32, %v2445_v31  ;;  %v2150_v48 = vadd.f32 %v2149_v36, %v4765_v61 }
 0x2a5   : > { %v2151_v42 = vpop.f32.mrf.mxu0  ;;  %v2448_v47 = vmax.f32 %v2148_v54, 0.0 }
 0x2a6   : > { %v2634_v35 = vrot.slane %v2633_v37, 2  ;;  %v2644_v43 = vmax.f32 %v2642_v29, %v2643_v38  ;;  %v2152_v45 = vadd.f32 %v2151_v42, %v4763_v49  ;;  %v2449_v55 = vmax.f32 %v2150_v48, 0.0 }
 0x2a7   : > { %v2153_v51 = vpop.f32.mrf.mxu0 }
 0x2a8   : > { %v2635_v3 = vmax.f32 %v2633_v37, %v2634_v35  ;;  %v2645_v52 = vrot.slane %v2644_v43, 2  ;;  %v2450_v53 = vmax.f32 %v2152_v45, 0.0  ;;  %v2154_v30 = vadd.f32 %v2153_v51, %v4765_v61 }
 0x2a9   : > { %v2157_v57 = vpop.f32.mrf.mxu0 }
 0x2aa   : > { %v2636_v58 = vrot.slane %v2635_v3, 1  ;;  %v2646_v60 = vmax.f32 %v2644_v43, %v2645_v52  ;;  %v2570_v59 = vpack.c.bf16 %v2450_v53, %v2448_v47  ;;  %v2451_v62 = vmax.f32 %v2154_v30, 0.0 }
 0x2ab   : > { %v2159_v63 = vpop.f32.mrf.mxu0  ;;  %v2158_v2 = vadd.f32 %v2157_v57, %v4763_v49 }
 0x2ac   : > { %v4783_v11 = vmax.f32 %v2635_v3, %v2636_v58  ;;  %v2647_v0 = vrot.slane %v2646_v60, 1  ;;  %v2650_v46 = vmax.bf16 %v2570_v59, %v2568_v34  ;;  %v2571_v1 = vpack.c.bf16 %v2451_v62, %v2449_v55 }
 0x2ad   : > { %v2160_v4 = vadd.f32 %v2159_v63, %v4765_v61  ;;  %v2161_v41 = vpop.f32.mrf.mxu0  ;;  %v2452_v39 = vmax.f32 %v2158_v2, 0.0 }
 0x2ae   : > { %v4789_v6 = vmax.f32 %v2646_v60, %v2647_v0  ;;  %v2651_v7 = vunpack.i.l.bf16 %v2650_v46  ;;  %v2652_v9 = vunpack.i.h.bf16 %v2650_v46  ;;  %v2661_v8 = vmax.bf16 %v2571_v1, %v2569_v40 }
 0x2af   : > { %v2162_v10 = vadd.f32 %v2161_v41, %v4763_v49  ;;  %v2163_v12 = vpop.f32.mrf.mxu0  ;;  %v2453_v19 = vmax.f32 %v2160_v4, 0.0 }
 0x2b0   : > { %v2653_v13 = vmax.f32 %v2651_v7, %v2652_v9  ;;  %v2164_v14 = vadd.f32 %v2163_v12, %v4765_v61  ;;  %v2662_v15 = vunpack.i.l.bf16 %v2661_v8  ;;  %v2663_v16 = vunpack.i.h.bf16 %v2661_v8 }
 0x2b1   : > { %v2454_v17 = vmax.f32 %v2162_v10, 0.0  ;;  %v2167_v33 = vpop.f32.mrf.mxu0 }
 0x2b2   : > { %v2654_v18 = vrot.slane %v2653_v13, 4  ;;  %v2455_v20 = vmax.f32 %v2164_v14, 0.0  ;;  %v2664_v21 = vmax.f32 %v2662_v15, %v2663_v16  ;;  %v2168_v25 = vadd.f32 %v2167_v33, %v4763_v49 }
 0x2b3   : > { %v2572_v22 = vpack.c.bf16 %v2454_v17, %v2452_v39  ;;  %v2169_v23 = vpop.f32.mrf.mxu0 }
 0x2b4   : > { %v2655_v56 = vmax.f32 %v2653_v13, %v2654_v18  ;;  %v2573_v24 = vpack.c.bf16 %v2455_v20, %v2453_v19  ;;  %v2665_v26 = vrot.slane %v2664_v21, 4  ;;  %v2170_v28 = vadd.f32 %v2169_v23, %v4765_v61 }
 0x2b5   : > { %v2171_v50 = vpop.f32.mrf.mxu0  ;;  %v2456_v54 = vmax.f32 %v2168_v25, 0.0 }
 0x2b6   : > { %v2656_v27 = vrot.slane %v2655_v56, 2  ;;  %v2172_v29 = vadd.f32 %v2171_v50, %v4763_v49  ;;  %v2666_v31 = vmax.f32 %v2664_v21, %v2665_v26  ;;  %v2457_v42 = vmax.f32 %v2170_v28, 0.0 }
 0x2b7   : > { %v2173_v32 = vpop.f32.mrf.mxu0 }
 0x2b8   : > { %v2657_v34 = vmax.f32 %v2655_v56, %v2656_v27  ;;  %v2458_v36 = vmax.f32 %v2172_v29, 0.0  ;;  %v2174_v37 = vadd.f32 %v2173_v32, %v4765_v61  ;;  %v2667_v38 = vrot.slane %v2666_v31, 2 }
 0x2b9   : > { %v2177_v40 = vpop.f32.mrf.mxu0 }
 0x2ba   : > { %v2658_v48 = vrot.slane %v2657_v34, 1  ;;  %v2574_v35 = vpack.c.bf16 %v2458_v36, %v2456_v54  ;;  %v2459_v43 = vmax.f32 %v2174_v37, 0.0  ;;  %v2668_v45 = vmax.f32 %v2666_v31, %v2667_v38 }
 0x2bb   : > { %v2179_v47 = vpop.f32.mrf.mxu0  ;;  %v2178_v30 = vadd.f32 %v2177_v40, %v4763_v49 }
 0x2bc   : > { %v4799_v51 = vmax.f32 %v2657_v34, %v2658_v48  ;;  %v2672_v3 = vmax.bf16 %v2574_v35, %v2572_v22  ;;  %v2575_v52 = vpack.c.bf16 %v2459_v43, %v2457_v42  ;;  %v2669_v53 = vrot.slane %v2668_v45, 1 }
 0x2bd   : > { %v2180_v55 = vadd.f32 %v2179_v47, %v4765_v61  ;;  %v2181_v57 = vpop.f32.mrf.mxu0  ;;  %v2460_v9 = vmax.f32 %v2178_v30, 0.0 }
 0x2be   : > { %v2673_v60 = vunpack.i.l.bf16 %v2672_v3  ;;  %v2674_v59 = vunpack.i.h.bf16 %v2672_v3  ;;  %v2683_v62 = vmax.bf16 %v2575_v52, %v2573_v24  ;;  %v4805_v63 = vmax.f32 %v2668_v45, %v2669_v53 }
 0x2bf   : > { %v2182_v0 = vadd.f32 %v2181_v57, %v4763_v49  ;;  %v2183_v46 = vpop.f32.mrf.mxu0  ;;  %v2461_v14 = vmax.f32 %v2180_v55, 0.0 }
 0x2c0   : > { %v2675_v1 = vmax.f32 %v2673_v60, %v2674_v59  ;;  %v2684_v2 = vunpack.i.l.bf16 %v2683_v62  ;;  %v2685_v4 = vunpack.i.h.bf16 %v2683_v62  ;;  %v2184_v41 = vadd.f32 %v2183_v46, %v4765_v61 }
 0x2c1   : > { %v2462_v8 = vmax.f32 %v2182_v0, 0.0  ;;  %v2187_v10 = vpop.f32.mrf.mxu0 }
 0x2c2   : > { %v2676_v12 = vrot.slane %v2675_v1, 4  ;;  %v2686_v13 = vmax.f32 %v2684_v2, %v2685_v4  ;;  %v2463_v15 = vmax.f32 %v2184_v41, 0.0  ;;  %v2188_v39 = vadd.f32 %v2187_v10, %v4763_v49 }
 0x2c3   : > { %v2576_v16 = vpack.c.bf16 %v2462_v8, %v2460_v9  ;;  %v2189_v17 = vpop.f32.mrf.mxu0 }
 0x2c4   : > { %v2677_v33 = vmax.f32 %v2675_v1, %v2676_v12  ;;  %v2687_v18 = vrot.slane %v2686_v13, 4  ;;  %v2577_v19 = vpack.c.bf16 %v2463_v15, %v2461_v14  ;;  %v2190_v20 = vadd.f32 %v2189_v17, %v4765_v61 }
 0x2c5   : > { %v2191_v21 = vpop.f32.mrf.mxu0  ;;  %v2464_v24 = vmax.f32 %v2188_v39, 0.0 }
 0x2c6   : > { %v2678_v22 = vrot.slane %v2677_v33, 2  ;;  %v2688_v23 = vmax.f32 %v2686_v13, %v2687_v18  ;;  %v2192_v56 = vadd.f32 %v2191_v21, %v4763_v49  ;;  %v2465_v31 = vmax.f32 %v2190_v20, 0.0 }
 0x2c7   : > { %v2193_v25 = vpop.f32.mrf.mxu0  ;;  %v2287_v26 = vpop.f32.mrf.mxu1 }
 0x2c8   : > { %v2679_v50 = vmax.f32 %v2677_v33, %v2678_v22  ;;  %v2689_v27 = vrot.slane %v2688_v23, 2  ;;  %v2466_v28 = vmax.f32 %v2192_v56, 0.0  ;;  %v2194_v29 = vadd.f32 %v2193_v25, %v4765_v61 }
 0x2c9   : > { %v2288_v32 = vadd.f32 %v2287_v26, %v4763_v49  ;;  %v2197_v34 = vpop.f32.mrf.mxu0  ;;  %v2289_v54 = vpop.f32.mrf.mxu1 }
 0x2ca   : > { %v2680_v36 = vrot.slane %v2679_v50, 1  ;;  %v2690_v37 = vmax.f32 %v2688_v23, %v2689_v27  ;;  %v2578_v38 = vpack.c.bf16 %v2466_v28, %v2464_v24  ;;  %v2467_v40 = vmax.f32 %v2194_v29, 0.0 }
 0x2cb   : > { %v2198_v48 = vadd.f32 %v2197_v34, %v4763_v49  ;;  %v2290_v42 = vadd.f32 %v2289_v54, %v4765_v61  ;;  %v2199_v35 = vpop.f32.mrf.mxu0  ;;  %v2291_v43 = vpop.f32.mrf.mxu1  ;;  %v2504_v53 = vmax.f32 %v2288_v32, 0.0 }
 0x2cc   : > { %v4818_v45 = vmax.f32 %v2679_v50, %v2680_v36  ;;  %v2691_v47 = vrot.slane %v2690_v37, 1  ;;  %v2694_v3 = vmax.bf16 %v2578_v38, %v2576_v16  ;;  %v2579_v52 = vpack.c.bf16 %v2467_v40, %v2465_v31 }
 0x2cd   : > { %v2468_v30 = vmax.f32 %v2198_v48, 0.0  ;;  %v2200_v55 = vadd.f32 %v2199_v35, %v4765_v61  ;;  %v2292_v57 = vadd.f32 %v2291_v43, %v4763_v49  ;;  %v2201_v60 = vpop.f32.mrf.mxu0  ;;  %v2293_v59 = vpop.f32.mrf.mxu1  ;;  %v2505_v4 = vmax.f32 %v2290_v42, 0.0 }
 0x2ce   : > { %v4824_v0 = vmax.f32 %v2690_v37, %v2691_v47  ;;  %v2695_v46 = vunpack.i.l.bf16 %v2694_v3  ;;  %v2696_v1 = vunpack.i.h.bf16 %v2694_v3  ;;  %v2705_v2 = vmax.bf16 %v2579_v52, %v2577_v19 }
 0x2cf   : > { %v2506_v41 = vmax.f32 %v2292_v57, 0.0  ;;  %v2202_v9 = vadd.f32 %v2201_v60, %v4763_v49  ;;  %v2203_v8 = vpop.f32.mrf.mxu0  ;;  %v2294_v13 = vadd.f32 %v2293_v59, %v4765_v61  ;;  %v2469_v20 = vmax.f32 %v2200_v55, 0.0 }
 0x2d0   : > { %v2697_v12 = vmax.f32 %v2695_v46, %v2696_v1  ;;  %v2204_v14 = vadd.f32 %v2203_v8, %v4765_v61  ;;  %v2706_v15 = vunpack.i.l.bf16 %v2705_v2  ;;  %v2707_v16 = vunpack.i.h.bf16 %v2705_v2 }
 0x2d1   : > { %v4831_v39 = vpack.c.bf16 %v2506_v41, %v2504_v53  ;;  %v2470_v17 = vmax.f32 %v2202_v9, 0.0  ;;  %v2207_v33 = vpop.f32.mrf.mxu0  ;;  %v2297_v18 = vpop.f32.mrf.mxu1  ;;  %v2507_v21 = vmax.f32 %v2294_v13, 0.0 }
 0x2d2   : > { %v2698_v19 = vrot.slane %v2697_v12, 4  ;;  %v2471_v22 = vmax.f32 %v2204_v14, 0.0  ;;  %v2708_v23 = vmax.f32 %v2706_v15, %v2707_v16  ;;  %v2208_v24 = vadd.f32 %v2207_v33, %v4763_v49 }
 0x2d3   : > { %v2580_v56 = vpack.c.bf16 %v2470_v17, %v2468_v30  ;;  %v2298_v25 = vadd.f32 %v2297_v18, %v4763_v49  ;;  %v2209_v26 = vpop.f32.mrf.mxu0  ;;  %v2299_v50 = vpop.f32.mrf.mxu1  ;;  %v4835_v28 = vpack.c.bf16 %v2507_v21, %v2505_v4 }
 0x2d4   : > { %v2699_v27 = vmax.f32 %v2697_v12, %v2698_v19  ;;  %v2581_v29 = vpack.c.bf16 %v2471_v22, %v2469_v20  ;;  %v2709_v31 = vrot.slane %v2708_v23, 4  ;;  %v2210_v32 = vadd.f32 %v2209_v26, %v4765_v61 }
 0x2d5   : > { %v2300_v34 = vadd.f32 %v2299_v50, %v4765_v61  ;;  %v2211_v54 = vpop.f32.mrf.mxu0  ;;  %v2301_v36 = vpop.f32.mrf.mxu1  ;;  %v2472_v42 = vmax.f32 %v2208_v24, 0.0  ;;  %v2508_v35 = vmax.f32 %v2298_v25, 0.0 }
 0x2d6   : > { %v2700_v37 = vrot.slane %v2699_v27, 2  ;;  %v2212_v38 = vadd.f32 %v2211_v54, %v4763_v49  ;;  %v2302_v40 = vadd.f32 %v2301_v36, %v4763_v49  ;;  %v2710_v48 = vmax.f32 %v2708_v23, %v2709_v31 }
 0x2d7   : > { %v2213_v43 = vpop.f32.mrf.mxu0  ;;  %v2303_v47 = vpop.f32.mrf.mxu1  ;;  %v2473_v57 = vmax.f32 %v2210_v32, 0.0  ;;  %v2509_v60 = vmax.f32 %v2300_v34, 0.0 }
 0x2d8   : > { %v2701_v3 = vmax.f32 %v2699_v27, %v2700_v37  ;;  %v2474_v52 = vmax.f32 %v2212_v38, 0.0  ;;  %v2510_v53 = vmax.f32 %v2302_v40, 0.0  ;;  %v2214_v30 = vadd.f32 %v2213_v43, %v4765_v61 }
 0x2d9   : > { %v2711_v55 = vrot.slane %v2710_v48, 2  ;;  %v2304_v59 = vadd.f32 %v2303_v47, %v4765_v61  ;;  %v2217_v46 = vpop.f32.mrf.mxu0  ;;  %v2307_v1 = vpop.f32.mrf.mxu1 }
 0x2da   : > { %v2702_v2 = vrot.slane %v2701_v3, 1  ;;  %v2582_v4 = vpack.c.bf16 %v2474_v52, %v2472_v42  ;;  %v2600_v41 = vpack.c.bf16 %v2510_v53, %v2508_v35  ;;  %v2475_v9 = vmax.f32 %v2214_v30, 0.0 }
 0x2db   : > { %v2712_v8 = vmax.f32 %v2710_v48, %v2711_v55  ;;  %v2511_v12 = vmax.f32 %v2304_v59, 0.0  ;;  %v2218_v13 = vadd.f32 %v2217_v46, %v4763_v49  ;;  %v2308_v14 = vadd.f32 %v2307_v1, %v4763_v49  ;;  %v2219_v15 = vpop.f32.mrf.mxu0  ;;  %v2309_v16 = vpop.f32.mrf.mxu1 }
 0x2dc   : > { %v4845_v17 = vmax.f32 %v2701_v3, %v2702_v2  ;;  %v2716_v33 = vmax.bf16 %v2582_v4, %v2580_v56  ;;  %v2583_v18 = vpack.c.bf16 %v2475_v9, %v2473_v57  ;;  %v2220_v19 = vadd.f32 %v2219_v15, %v4765_v61 }
 0x2dd   : > { %v2713_v20 = vrot.slane %v2712_v8, 1  ;;  %v2601_v21 = vpack.c.bf16 %v2511_v12, %v2509_v60  ;;  %v2476_v22 = vmax.f32 %v2218_v13, 0.0  ;;  %v2512_v23 = vmax.f32 %v2308_v14, 0.0  ;;  %v2221_v24 = vpop.f32.mrf.mxu0  ;;  %v2311_v25 = vpop.f32.mrf.mxu1 }
 0x2de   : > { %v2717_v50 = vunpack.i.l.bf16 %v2716_v33  ;;  %v2718_v27 = vunpack.i.h.bf16 %v2716_v33  ;;  %v2727_v31 = vmax.bf16 %v2583_v18, %v2581_v29  ;;  %v2477_v34 = vmax.f32 %v2220_v19, 0.0 }
 0x2df   : > { %v4850_v32 = vmax.f32 %v2712_v8, %v2713_v20  ;;  %v2310_v56 = vadd.f32 %v2309_v16, %v4765_v61  ;;  %v2222_v54 = vadd.f32 %v2221_v24, %v4763_v49  ;;  %v2223_v36 = vpop.f32.mrf.mxu0  ;;  %v2313_v37 = vpop.f32.mrf.mxu1  ;;  %v2312_v42 = vadd.f32 %v2311_v25, %v4763_v49 }
 0x2e0   : > { %v2719_v38 = vmax.f32 %v2717_v50, %v2718_v27  ;;  %v2728_v40 = vunpack.i.l.bf16 %v2727_v31  ;;  %v2729_v48 = vunpack.i.h.bf16 %v2727_v31  ;;  %v2224_v29 = vadd.f32 %v2223_v36, %v4765_v61 }
 0x2e1   : > { %v2513_v43 = vmax.f32 %v2310_v56, 0.0  ;;  %v2478_v47 = vmax.f32 %v2222_v54, 0.0  ;;  %v2227_v3 = vpop.f32.mrf.mxu0  ;;  %v2317_v52 = vpop.f32.mrf.mxu1  ;;  %v2514_v55 = vmax.f32 %v2312_v42, 0.0  ;;  %v2314_v57 = vadd.f32 %v2313_v37, %v4765_v61 }
 0x2e2   : > { %v2720_v53 = vrot.slane %v2719_v38, 4  ;;  %v2730_v30 = vmax.f32 %v2728_v40, %v2729_v48  ;;  %v2479_v59 = vmax.f32 %v2224_v29, 0.0  ;;  %v2228_v46 = vadd.f32 %v2227_v3, %v4763_v49 }
 0x2e3   : > { %v2584_v60 = vpack.c.bf16 %v2478_v47, %v2476_v22  ;;  %v2318_v1 = vadd.f32 %v2317_v52, %v4763_v49  ;;  %v2229_v2 = vpop.f32.mrf.mxu0  ;;  %v2319_v4 = vpop.f32.mrf.mxu1  ;;  %v2602_v12 = vpack.c.bf16 %v2514_v55, %v2512_v23  ;;  %v2515_v13 = vmax.f32 %v2314_v57, 0.0 }
 0x2e4   : > { %v2721_v9 = vmax.f32 %v2719_v38, %v2720_v53  ;;  %v2731_v8 = vrot.slane %v2730_v30, 4  ;;  %v2585_v14 = vpack.c.bf16 %v2479_v59, %v2477_v34  ;;  %v2480_v15 = vmax.f32 %v2228_v46, 0.0 }
 0x2e5   : > { %v2516_v16 = vmax.f32 %v2318_v1, 0.0  ;;  %v2230_v33 = vadd.f32 %v2229_v2, %v4765_v61  ;;  %v2231_v18 = vpop.f32.mrf.mxu0  ;;  %v2321_v19 = vpop.f32.mrf.mxu1  ;;  %v2826_v24 = vmax.bf16 %v2602_v12, %v2600_v41  ;;  %v2603_v25 = vpack.c.bf16 %v2515_v13, %v2513_v43 }
 0x2e6   : > { %v2722_v20 = vrot.slane %v2721_v9, 2  ;;  %v2732_v22 = vmax.f32 %v2730_v30, %v2731_v8  ;;  %v2320_v27 = vadd.f32 %v2319_v4, %v4765_v61  ;;  %v2232_v31 = vadd.f32 %v2231_v18, %v4763_v49 }
 0x2e7   : > { %v2481_v50 = vmax.f32 %v2230_v33, 0.0  ;;  %v2322_v56 = vadd.f32 %v2321_v19, %v4763_v49  ;;  %v2233_v23 = vpop.f32.mrf.mxu0  ;;  %v2323_v54 = vpop.f32.mrf.mxu1  ;;  %v2827_v37 = vunpack.i.l.bf16 %v2826_v24  ;;  %v2828_v38 = vunpack.i.h.bf16 %v2826_v24 }
 0x2e8   : > { %v2723_v34 = vmax.f32 %v2721_v9, %v2722_v20  ;;  %v2733_v36 = vrot.slane %v2732_v22, 2  ;;  %v2837_v40 = vmax.bf16 %v2603_v25, %v2601_v21  ;;  %v2517_v48 = vmax.f32 %v2320_v27, 0.0 }
 0x2e9   : > { %v2482_v42 = vmax.f32 %v2232_v31, 0.0  ;;  %v2518_v47 = vmax.f32 %v2322_v56, 0.0  ;;  %v2237_v29 = vpop.f32.mrf.mxu0  ;;  %v2327_v41 = vpop.f32.mrf.mxu1  ;;  %v2829_v52 = vmax.f32 %v2827_v37, %v2828_v38  ;;  %v2234_v53 = vadd.f32 %v2233_v23, %v4765_v61 }
 0x2ea   : > { %v2724_v43 = vrot.slane %v2723_v34, 1  ;;  %v2734_v3 = vmax.f32 %v2732_v22, %v2733_v36  ;;  %v2838_v30 = vunpack.i.l.bf16 %v2837_v40  ;;  %v2839_v55 = vunpack.i.h.bf16 %v2837_v40 }
 0x2eb   : > { %v2586_v57 = vpack.c.bf16 %v2482_v42, %v2480_v15  ;;  %v4866_v59 = vpack.c.bf16 %v2518_v47, %v2516_v16  ;;  %v2239_v46 = vpop.f32.mrf.mxu0  ;;  %v2329_v1 = vpop.f32.mrf.mxu1  ;;  %v2830_v4 = vrot.slane %v2829_v52, 4  ;;  %v2483_v9 = vmax.f32 %v2234_v53, 0.0 }
 0x2ec   : > { %v4868_v2 = vmax.f32 %v2723_v34, %v2724_v43  ;;  %v2735_v21 = vrot.slane %v2734_v3, 1  ;;  %v2840_v8 = vmax.f32 %v2838_v30, %v2839_v55  ;;  %v2324_v13 = vadd.f32 %v2323_v54, %v4765_v61 }
 0x2ed   : > { %v2738_v12 = vmax.bf16 %v2586_v57, %v2584_v60  ;;  %v2238_v33 = vadd.f32 %v2237_v29, %v4763_v49  ;;  %v2241_v18 = vpop.f32.mrf.mxu0  ;;  %v2331_v19 = vpop.f32.mrf.mxu1  ;;  %v2831_v20 = vmax.f32 %v2829_v52, %v2830_v4  ;;  %v2587_v22 = vpack.c.bf16 %v2483_v9, %v2481_v50 }
 0x2ee   : > { %v4874_v16 = vmax.f32 %v2734_v3, %v2735_v21  ;;  %v2841_v24 = vrot.slane %v2840_v8, 4  ;;  %v2519_v31 = vmax.f32 %v2324_v13, 0.0  ;;  %v2328_v40 = vadd.f32 %v2327_v41, %v4763_v49 }
 0x2ef   : > { %v2739_v25 = vunpack.i.l.bf16 %v2738_v12  ;;  %v2740_v27 = vunpack.i.h.bf16 %v2738_v12  ;;  %v2243_v56 = vpop.f32.mrf.mxu0  ;;  %v2333_v23 = vpop.f32.mrf.mxu1  ;;  %v2832_v54 = vrot.slane %v2831_v20, 2  ;;  %v2749_v34 = vmax.bf16 %v2587_v22, %v2585_v14 }
 0x2f0   : > { %v2842_v36 = vmax.f32 %v2840_v8, %v2841_v24  ;;  %v2605_v38 = vpack.c.bf16 %v2519_v31, %v2517_v48  ;;  %v4880_v3 = vadd.f32 %v2239_v46, %v4765_v61  ;;  %v2484_v30 = vmax.f32 %v2238_v33, 0.0 }
 0x2f1   : > { %v2741_v37 = vmax.f32 %v2739_v25, %v2740_v27  ;;  %v2247_v42 = vpop.f32.mrf.mxu0  ;;  %v2337_v47 = vpop.f32.mrf.mxu1  ;;  %v2833_v29 = vmax.f32 %v2831_v20, %v2832_v54  ;;  %v2750_v50 = vunpack.i.l.bf16 %v2749_v34  ;;  %v2751_v43 = vunpack.i.h.bf16 %v2749_v34 }
 0x2f2   : > { %v2843_v52 = vrot.slane %v2842_v36, 2  ;;  %v2520_v55 = vmax.f32 %v2328_v40, 0.0  ;;  %v2330_v48 = vadd.f32 %v2329_v1, %v4765_v61  ;;  %v2242_v41 = vadd.f32 %v2241_v18, %v4763_v49 }
 0x2f3   : > { %v2742_v53 = vrot.slane %v2741_v37, 4  ;;  %v2249_v57 = vpop.f32.mrf.mxu0  ;;  %v2339_v21 = vpop.f32.mrf.mxu1  ;;  %v2834_v14 = vrot.slane %v2833_v29, 1  ;;  %v2752_v4 = vmax.f32 %v2750_v50, %v2751_v43  ;;  %v2485_v12 = vmax.f32 %v4880_v3, 0.0 }
 0x2f4   : > { %v2844_v9 = vmax.f32 %v2842_v36, %v2843_v52  ;;  %v2332_v13 = vadd.f32 %v2331_v19, %v4763_v49  ;;  %v2486_v24 = vmax.f32 %v2242_v41, 0.0  ;;  %v4889_v25 = vadd.f32 %v2243_v56, %v4765_v61 }
 0x2f5   : > { %v2743_v8 = vmax.f32 %v2741_v37, %v2742_v53  ;;  %v2251_v46 = vpop.f32.mrf.mxu0  ;;  %v2341_v20 = vpop.f32.mrf.mxu1  ;;  %v4886_v22 = vmax.f32 %v2833_v29, %v2834_v14  ;;  %v2753_v33 = vrot.slane %v2752_v4, 4  ;;  %v2334_v18 = vadd.f32 %v2333_v23, %v4765_v61 }
 0x2f6   : > { %v2845_v27 = vrot.slane %v2844_v9, 1  ;;  %v2522_v1 = vmax.f32 %v2332_v13, 0.0  ;;  %v2521_v37 = vmax.f32 %v2330_v48, 0.0  ;;  %v2588_v40 = vpack.c.bf16 %v2486_v24, %v2484_v30 }
 0x2f7   : > { %v2744_v31 = vrot.slane %v2743_v8, 2  ;;  %v2253_v54 = vpop.f32.mrf.mxu0  ;;  %v2343_v34 = vpop.f32.mrf.mxu1  ;;  %v2754_v19 = vmax.f32 %v2752_v4, %v2753_v33  ;;  %v2523_v52 = vmax.f32 %v2334_v18, 0.0  ;;  %v2487_v41 = vmax.f32 %v4889_v25, 0.0 }
 0x2f8   : > { %v4894_v29 = vmax.f32 %v2844_v9, %v2845_v27  ;;  %v2606_v43 = vpack.c.bf16 %v2522_v1, %v2520_v55  ;;  %v2248_v23 = vadd.f32 %v2247_v42, %v4763_v49  ;;  %v2338_v13 = vadd.f32 %v2337_v47, %v4763_v49 }
 0x2f9   : > { %v2745_v50 = vmax.f32 %v2743_v8, %v2744_v31  ;;  %v2257_v56 = vpop.f32.mrf.mxu0  ;;  %v2347_v53 = vpop.f32.mrf.mxu1  ;;  %v2755_v14 = vrot.slane %v2754_v19, 2  ;;  %v2607_v48 = vpack.c.bf16 %v2523_v52, %v2521_v37  ;;  %v2250_v27 = vadd.f32 %v2249_v57, %v4765_v61 }
 0x2fa   : > { %v2848_v30 = vmax.bf16 %v2606_v43, %v4866_v59  ;;  %v2488_v33 = vmax.f32 %v2248_v23, 0.0  ;;  %v2524_v24 = vmax.f32 %v2338_v13, 0.0  ;;  %v2340_v59 = vadd.f32 %v2339_v21, %v4765_v61 }
 0x2fb   : > { %v2746_v4 = vrot.slane %v2745_v50, 1  ;;  %v4902_v9 = vpop.f32.mrf.mxu0  ;;  %v2349_v55 = vpop.f32.mrf.mxu1  ;;  %v2756_v8 = vmax.f32 %v2754_v19, %v2755_v14  ;;  %v2859_v47 = vmax.bf16 %v2607_v48, %v2605_v38  ;;  %v2489_v60 = vmax.f32 %v2250_v27, 0.0 }
 0x2fc   : > { %v2849_v42 = vunpack.i.l.bf16 %v2848_v30  ;;  %v2850_v31 = vunpack.i.h.bf16 %v2848_v30  ;;  %v2252_v37 = vadd.f32 %v2251_v46, %v4763_v49  ;;  %v2525_v13 = vmax.f32 %v2340_v59, 0.0 }
 0x2fd   : > { %v4905_v25 = vmax.f32 %v2745_v50, %v2746_v4  ;;  %v2261_v1 = vpop.f32.mrf.mxu0  ;;  %v2351_v18 = vpop.f32.mrf.mxu1  ;;  %v2757_v36 = vrot.slane %v2756_v8, 1  ;;  %v2860_v52 = vunpack.i.l.bf16 %v2859_v47  ;;  %v2861_v14 = vunpack.i.h.bf16 %v2859_v47 }
 0x2fe   : > { %v2851_v43 = vmax.f32 %v2849_v42, %v2850_v31  ;;  %v2490_v38 = vmax.f32 %v2252_v37, 0.0  ;;  %v2342_v4 = vadd.f32 %v2341_v20, %v4763_v49  ;;  %v2254_v21 = vadd.f32 %v2253_v54, %v4765_v61 }
 0x2ff   : > { %v2263_v57 = vpop.f32.mrf.mxu0  ;;  %v2353_v50 = vpop.f32.mrf.mxu1  ;;  %v4911_v23 = vmax.f32 %v2756_v8, %v2757_v36  ;;  %v2862_v48 = vmax.f32 %v2860_v52, %v2861_v14  ;;  %v2344_v46 = vadd.f32 %v2343_v34, %v4765_v61  ;;  %v4921_v36 = vadd.f32 %v2257_v56, %v4763_v49 }
 0x300   : > { %v2852_v30 = vrot.slane %v2851_v43, 4  ;;  %v2590_v31 = vpack.c.bf16 %v2490_v38, %v2488_v33  ;;  %v2526_v47 = vmax.f32 %v2342_v4, 0.0  ;;  %v2491_v20 = vmax.f32 %v2254_v21, 0.0 }
 0x301   : > { %v4916_v27 = vpop.f32.mrf.mxu1  ;;  %v2267_v8 = vpop.f32.mrf.mxu0  ;;  %v2863_v37 = vrot.slane %v2862_v48, 4  ;;  %v2527_v35 = vmax.f32 %v2344_v46, 0.0  ;;  %v2589_v54 = vpack.c.bf16 %v2487_v41, %v2485_v12  ;;  %v2348_v10 = vadd.f32 %v2347_v53, %v4763_v49 }
 0x302   : > { %v2853_v59 = vmax.f32 %v2851_v43, %v2852_v30  ;;  %v2760_v34 = vmax.bf16 %v2590_v31, %v2588_v40  ;;  %v2608_v14 = vpack.c.bf16 %v2526_v47, %v2524_v24  ;;  %v2591_v38 = vpack.c.bf16 %v2491_v20, %v2489_v60 }
 0x303   : > { %v4923_v52 = vpop.f32.mrf.mxu1  ;;  %v2864_v33 = vmax.f32 %v2862_v48, %v2863_v37  ;;  %v2609_v4 = vpack.c.bf16 %v2527_v35, %v2525_v13  ;;  %v2492_v30 = vmax.f32 %v4921_v36, 0.0  ;;  %v2269_v21 = vpop.f32.mrf.mxu0  ;;  %v2350_v3 = vadd.f32 %v2349_v55, %v4765_v61 }
 0x304   : > { %v2854_v42 = vrot.slane %v2853_v59, 2  ;;  %v2761_v7 = vunpack.i.l.bf16 %v2760_v34  ;;  %v2762_v43 = vunpack.i.h.bf16 %v2760_v34  ;;  %v2771_v19 = vmax.bf16 %v2591_v38, %v2589_v54 }
 0x305   : > { %v4928_v56 = vpop.f32.mrf.mxu1  ;;  %v2865_v44 = vrot.slane %v2864_v33, 2  ;;  %v2528_v53 = vmax.f32 %v2348_v10, 0.0  ;;  %v2262_v41 = vadd.f32 %v2261_v1, %v4763_v49  ;;  %v2352_v35 = vadd.f32 %v2351_v18, %v4763_v49 }
 0x306   : > { %v2855_v46 = vmax.f32 %v2853_v59, %v2854_v42  ;;  %v2763_v40 = vmax.f32 %v2761_v7, %v2762_v43  ;;  %v2772_v13 = vunpack.i.l.bf16 %v2771_v19  ;;  %v2773_v48 = vunpack.i.h.bf16 %v2771_v19  ;;  %v2271_v59 = vpop.f32.mrf.mxu0 }
 0x307   : > { %v4932_v12 = vpop.f32.mrf.mxu1  ;;  %v2866_v24 = vmax.f32 %v2864_v33, %v2865_v44  ;;  %v2260_v42 = vadd.f32 %v4902_v9, %v4765_v61  ;;  %v2529_v36 = vmax.f32 %v2350_v3, 0.0  ;;  %v2530_v55 = vmax.f32 %v2352_v35, 0.0 }
 0x308   : > { %v2856_v60 = vrot.slane %v2855_v46, 1  ;;  %v2764_v47 = vrot.slane %v2763_v40, 4  ;;  %v2774_v10 = vmax.f32 %v2772_v13, %v2773_v48  ;;  %v2264_v1 = vadd.f32 %v2263_v57, %v4765_v61 }
 0x309   : > { %v4936_v31 = vpop.f32.mrf.mxu1  ;;  %v2867_v7 = vrot.slane %v2866_v24, 1  ;;  %v2494_v20 = vmax.f32 %v2262_v41, 0.0  ;;  %v2610_v19 = vpack.c.bf16 %v2530_v55, %v2528_v53  ;;  %v2354_v54 = vadd.f32 %v2353_v50, %v4765_v61 }
 0x30a   : > { %v4940_v37 = vmax.f32 %v2855_v46, %v2856_v60  ;;  %v2765_v44 = vmax.f32 %v2763_v40, %v2764_v47  ;;  %v2775_v33 = vrot.slane %v2774_v10, 4  ;;  %v2495_v38 = vmax.f32 %v2264_v1, 0.0  ;;  %v2273_v60 = vpop.f32.mrf.mxu0 }
 0x30b   : > { %v4943_v18 = vpop.f32.mrf.mxu1  ;;  %v4948_v9 = vmax.f32 %v2866_v24, %v2867_v7  ;;  %v2870_v3 = vmax.bf16 %v2610_v19, %v2608_v14  ;;  %v2531_v35 = vmax.f32 %v2354_v54, 0.0  ;;  %v2268_v57 = vadd.f32 %v2267_v8, %v4763_v49 }
 0x30c   : > { %v2766_v46 = vrot.slane %v2765_v44, 2  ;;  %v2776_v53 = vmax.f32 %v2774_v10, %v2775_v33  ;;  %v2493_v50 = vmax.f32 %v2260_v42, 0.0  ;;  %v2358_v41 = vadd.f32 %v4916_v27, %v4763_v49  ;;  %v2277_v42 = vpop.f32.mrf.mxu0 }
 0x30d   : > { %v4950_v43 = vpop.f32.mrf.mxu1  ;;  %v2871_v48 = vunpack.i.l.bf16 %v2870_v3  ;;  %v2872_v47 = vunpack.i.h.bf16 %v2870_v3  ;;  %v2611_v55 = vpack.c.bf16 %v2531_v35, %v2529_v36  ;;  %v2592_v14 = vpack.c.bf16 %v2494_v20, %v2492_v30 }
 0x30e   : > { %v2767_v13 = vmax.f32 %v2765_v44, %v2766_v46  ;;  %v2777_v7 = vrot.slane %v2776_v53, 2  ;;  %v2593_v1 = vpack.c.bf16 %v2495_v38, %v2493_v50  ;;  %v2496_v19 = vmax.f32 %v2268_v57, 0.0 }
 0x30f   : > { %v4957_v24 = vpop.f32.mrf.mxu1  ;;  %v2873_v34 = vmax.f32 %v2871_v48, %v2872_v47  ;;  %v2881_v40 = vmax.bf16 %v2611_v55, %v2609_v4  ;;  %v2532_v10 = vmax.f32 %v2358_v41, 0.0  ;;  %v2270_v27 = vadd.f32 %v2269_v21, %v4765_v61  ;;  %v2279_v41 = vpop.f32.mrf.mxu0 }
 0x310   : > { %v2768_v54 = vrot.slane %v2767_v13, 1  ;;  %v2778_v33 = vmax.f32 %v2776_v53, %v2777_v7  ;;  %v2272_v15 = vadd.f32 %v2271_v59, %v4763_v49  ;;  %v2362_v44 = vadd.f32 %v4928_v56, %v4763_v49 }
 0x311   : > { %v4959_v8 = vpop.f32.mrf.mxu1  ;;  %v2874_v20 = vrot.slane %v2873_v34, 4  ;;  %v2882_v38 = vunpack.i.l.bf16 %v2881_v40  ;;  %v2883_v46 = vunpack.i.h.bf16 %v2881_v40  ;;  %v2360_v4 = vadd.f32 %v4923_v52, %v4765_v61 }
 0x312   : > { %v4967_v30 = vmax.f32 %v2767_v13, %v2768_v54  ;;  %v2779_v3 = vrot.slane %v2778_v33, 1  ;;  %v2498_v35 = vmax.f32 %v2272_v15, 0.0  ;;  %v2534_v57 = vmax.f32 %v2362_v44, 0.0 }
 0x313   : > { %v4965_v36 = vpop.f32.mrf.mxu1  ;;  %v2875_v59 = vmax.f32 %v2873_v34, %v2874_v20  ;;  %v2884_v56 = vmax.f32 %v2882_v38, %v2883_v46  ;;  %v2274_v50 = vadd.f32 %v2273_v60, %v4765_v61  ;;  %v2497_v48 = vmax.f32 %v2270_v27, 0.0 }
 0x314   : > { %v4976_v13 = vmax.f32 %v2778_v33, %v2779_v3  ;;  %v2594_v40 = vpack.c.bf16 %v2498_v35, %v2496_v19  ;;  %v2364_v47 = vadd.f32 %v4932_v12, %v4765_v61  ;;  %v2278_v54 = vadd.f32 %v2277_v42, %v4763_v49  ;;  %v2281_v12 = vpop.f32.mrf.mxu0 }
 0x315   : > { %v4971_v53 = vpop.f32.mrf.mxu1  ;;  %v2876_v15 = vrot.slane %v2875_v59, 2  ;;  %v2885_v55 = vrot.slane %v2884_v56, 4  ;;  %v2499_v7 = vmax.f32 %v2274_v50, 0.0  ;;  %v2533_v44 = vmax.f32 %v2360_v4, 0.0 }
 0x316   : > { %v2782_v60 = vmax.bf16 %v2594_v40, %v2592_v14  ;;  %v2535_v20 = vmax.f32 %v2364_v47, 0.0  ;;  %v2612_v38 = vpack.c.bf16 %v2534_v57, %v2532_v10  ;;  %v2500_v21 = vmax.f32 %v2278_v54, 0.0 }
 0x317   : > { %v4980_v52 = vpop.f32.mrf.mxu1  ;;  %v2877_v27 = vmax.f32 %v2875_v59, %v2876_v15  ;;  %v2886_v19 = vmax.f32 %v2884_v56, %v2885_v55  ;;  %v2595_v46 = vpack.c.bf16 %v2499_v7, %v2497_v48  ;;  %v2368_v50 = vadd.f32 %v4936_v31, %v4763_v49  ;;  %v2283_v55 = vpop.f32.mrf.mxu0 }
 0x318   : > { %v2783_v3 = vunpack.i.l.bf16 %v2782_v60  ;;  %v2784_v35 = vunpack.i.h.bf16 %v2782_v60  ;;  %v2613_v14 = vpack.c.bf16 %v2535_v20, %v2533_v44  ;;  %v2280_v47 = vadd.f32 %v2279_v41, %v4765_v61 }
 0x319   : > { %v4985_v33 = vpop.f32.mrf.mxu1  ;;  %v2878_v26 = vrot.slane %v2877_v27, 1  ;;  %v2887_v34 = vrot.slane %v2886_v19, 2  ;;  %v2793_v4 = vmax.bf16 %v2595_v46, %v2593_v1  ;;  %v2282_v59 = vadd.f32 %v2281_v12, %v4763_v49 }
 0x31a   : > { %v2785_v40 = vmax.f32 %v2783_v3, %v2784_v35  ;;  %v2372_v10 = vadd.f32 %v4950_v43, %v4763_v49  ;;  %v2536_v54 = vmax.f32 %v2368_v50, 0.0  ;;  %v2370_v1 = vadd.f32 %v4943_v18, %v4765_v61 }
 0x31b   : > { %v4989_v42 = vpop.f32.mrf.mxu1  ;;  %v4997_v56 = vmax.f32 %v2877_v27, %v2878_v26  ;;  %v2888_v48 = vmax.f32 %v2886_v19, %v2887_v34  ;;  %v2794_v31 = vunpack.i.l.bf16 %v2793_v4  ;;  %v2795_v15 = vunpack.i.h.bf16 %v2793_v4 }
 0x31c   : > { %v2786_v7 = vrot.slane %v2785_v40, 4  ;;  %v2502_v44 = vmax.f32 %v2282_v59, 0.0  ;;  %v2538_v46 = vmax.f32 %v2372_v10, 0.0  ;;  %v2284_v34 = vadd.f32 %v2283_v55, %v4765_v61 }
 0x31d   : > { %v4995_v57 = vpop.f32.mrf.mxu1  ;;  %v2889_v43 = vrot.slane %v2888_v48, 1  ;;  %v2796_v20 = vmax.f32 %v2794_v31, %v2795_v15  ;;  %v2374_v19 = vadd.f32 %v4957_v24, %v4765_v61  ;;  %v2501_v35 = vmax.f32 %v2280_v47, 0.0 }
 0x31e   : > { %v2787_v26 = vmax.f32 %v2785_v40, %v2786_v7  ;;  %v2596_v27 = vpack.c.bf16 %v2502_v44, %v2500_v21  ;;  %v2614_v50 = vpack.c.bf16 %v2538_v46, %v2536_v54  ;;  %v2503_v60 = vmax.f32 %v2284_v34, 0.0 }
 0x31f   : > { %v5001_v41 = vpop.f32.mrf.mxu1  ;;  %v5010_v3 = vmax.f32 %v2888_v48, %v2889_v43  ;;  %v2797_v18 = vrot.slane %v2796_v20, 4  ;;  %v2539_v31 = vmax.f32 %v2374_v19, 0.0  ;;  %v2537_v15 = vmax.f32 %v2370_v1, 0.0 }
 0x320   : > { %v2788_v4 = vrot.slane %v2787_v26, 2  ;;  %v2804_v59 = vmax.bf16 %v4831_v39, %v2596_v27  ;;  %v2892_v24 = vmax.bf16 %v2614_v50, %v2612_v38  ;;  %v2597_v44 = vpack.c.bf16 %v2503_v60, %v2501_v35 }
 0x321   : > { %v5008_v12 = vpop.f32.mrf.mxu1  ;;  %5392 = vst [vmem:[#allocation4_spill] sm:$0xff] %v5010_v3  ;;  %v2798_v40 = vmax.f32 %v2796_v20, %v2797_v18  ;;  %v2615_v39 = vpack.c.bf16 %v2539_v31, %v2537_v15  ;;  %v2378_v21 = vadd.f32 %v4959_v8, %v4763_v49  ;;  %v2380_v60 = vadd.f32 %v4965_v36, %v4765_v61 }
 0x322   : > { %v2789_v55 = vmax.f32 %v2787_v26, %v2788_v4  ;;  %v2805_v7 = vunpack.i.l.bf16 %v2804_v59  ;;  %v2806_v48 = vunpack.i.h.bf16 %v2804_v59  ;;  %v2893_v54 = vunpack.i.l.bf16 %v2892_v24 }
 0x323   : > { %v5013_v10 = vpop.f32.mrf.mxu1  ;;  %v2799_v47 = vrot.slane %v2798_v40, 2  ;;  %v2894_v46 = vunpack.i.h.bf16 %v2892_v24  ;;  %v2815_v19 = vmax.bf16 %v4835_v28, %v2597_v44  ;;  %v2903_v26 = vmax.bf16 %v2615_v39, %v2613_v14 }
 0x324   : > { %v2790_v27 = vrot.slane %v2789_v55, 1  ;;  %v2807_v34 = vmax.f32 %v2805_v7, %v2806_v48  ;;  %v2382_v14 = vadd.f32 %v4971_v53, %v4763_v49  ;;  %v2384_v39 = vadd.f32 %v4980_v52, %v4765_v61 }
 0x325   : > { %v5017_v43 = vpop.f32.mrf.mxu1  ;;  %v2800_v38 = vmax.f32 %v2798_v40, %v2799_v47  ;;  %v2895_v1 = vmax.f32 %v2893_v54, %v2894_v46  ;;  %v2816_v50 = vunpack.i.l.bf16 %v2815_v19  ;;  %v2817_v4 = vunpack.i.h.bf16 %v2815_v19 }
 0x326   : > { %v5026_v18 = vmax.f32 %v2789_v55, %v2790_v27  ;;  %v2808_v35 = vrot.slane %v2807_v34, 4  ;;  %v2904_v15 = vunpack.i.l.bf16 %v2903_v26  ;;  %v2905_v24 = vunpack.i.h.bf16 %v2903_v26 }
 0x327   : > { %v5022_v20 = vpop.f32.mrf.mxu1  ;;  %v2801_v31 = vrot.slane %v2800_v38, 1  ;;  %v2896_v28 = vrot.slane %v2895_v1, 4  ;;  %v2818_v7 = vmax.f32 %v2816_v50, %v2817_v4  ;;  %v2540_v46 = vmax.f32 %v2378_v21, 0.0 }
 0x328   : > { %v2809_v40 = vmax.f32 %v2807_v34, %v2808_v35  ;;  %v2906_v44 = vmax.f32 %v2904_v15, %v2905_v24  ;;  %v2388_v53 = vadd.f32 %v4985_v33, %v4763_v49  ;;  %v2541_v50 = vmax.f32 %v2380_v60, 0.0 }
 0x329   : > { %v5028_v59 = vpop.f32.mrf.mxu1  ;;  %v5036_v55 = vmax.f32 %v2800_v38, %v2801_v31  ;;  %v2897_v48 = vmax.f32 %v2895_v1, %v2896_v28  ;;  %v2819_v54 = vrot.slane %v2818_v7, 4  ;;  %v2542_v1 = vmax.f32 %v2382_v14, 0.0 }
 0x32a   : > { %v2810_v47 = vrot.slane %v2809_v40, 2  ;;  %v2907_v26 = vrot.slane %v2906_v44, 4  ;;  %v2390_v21 = vadd.f32 %v4989_v42, %v4765_v61  ;;  %v2392_v52 = vadd.f32 %v4995_v57, %v4763_v49 }
 0x32b   : > { %v5034_v36 = vpop.f32.mrf.mxu1  ;;  %v2898_v19 = vrot.slane %v2897_v48, 2  ;;  %v2820_v38 = vmax.f32 %v2818_v7, %v2819_v54  ;;  %v2543_v34 = vmax.f32 %v2384_v39, 0.0  ;;  %v2394_v8 = vadd.f32 %v5001_v41, %v4765_v61 }
 0x32c   : > { %v2811_v35 = vmax.f32 %v2809_v40, %v2810_v47  ;;  %v2908_v28 = vmax.f32 %v2906_v44, %v2907_v26  ;;  %v2544_v60 = vmax.f32 %v2388_v53, 0.0  ;;  %v2546_v14 = vmax.f32 %v2392_v52, 0.0 }
 0x32d   : > { %v2411_v27 = vpop.f32.mrf.mxu1  ;;  %v2899_v31 = vmax.f32 %v2897_v48, %v2898_v19  ;;  %v2821_v24 = vrot.slane %v2820_v38, 2  ;;  %v2545_v44 = vmax.f32 %v2390_v21, 0.0  ;;  %v2547_v54 = vmax.f32 %v2394_v8, 0.0 }
 0x32e   : > { %v2812_v15 = vrot.slane %v2811_v35, 1  ;;  %v2909_v7 = vrot.slane %v2908_v28, 2  ;;  %v2616_v26 = vpack.c.bf16 %v2542_v1, %v2540_v46  ;;  %v2618_v62 = vpack.c.bf16 %v2546_v14, %v2544_v60 }
 0x32f   : > { %v2413_v4 = vpop.f32.mrf.mxu1  ;;  %v2900_v40 = vrot.slane %v2899_v31, 1  ;;  %v2822_v48 = vmax.f32 %v2820_v38, %v2821_v24  ;;  %v2617_v58 = vpack.c.bf16 %v2543_v34, %v2541_v50  ;;  %v2619_v5 = vpack.c.bf16 %v2547_v54, %v2545_v44 }
 0x330   : > { %v5050_v47 = vmax.f32 %v2811_v35, %v2812_v15  ;;  %v2910_v57 = vmax.f32 %v2908_v28, %v2909_v7  ;;  %v2914_v38 = vmax.bf16 %v2618_v62, %v2616_v26  ;;  %v2398_v8 = vadd.f32 %v5008_v12, %v4763_v49 }
 0x331   : > { %v2417_v33 = vpop.f32.mrf.mxu1  ;;  %v5052_v19 = vmax.f32 %v2899_v31, %v2900_v40  ;;  %v2823_v41 = vrot.slane %v2822_v48, 1  ;;  %v2925_v28 = vmax.bf16 %v2619_v5, %v2617_v58  ;;  %v2402_v46 = vadd.f32 %v5017_v43, %v4763_v49 }
 0x332   : > { %v2814_v39 = vpack.i.bf16 %v5050_v47, %v5050_v47  ;;  %v2911_v35 = vrot.slane %v2910_v57, 1  ;;  %v2404_v1 = vadd.f32 %v5022_v20, %v4765_v61  ;;  %v2915_v21 = vunpack.i.l.bf16 %v2914_v38 }
 0x333   : > { %v2419_v42 = vpop.f32.mrf.mxu1  ;;  %v5060_v31 = vmax.f32 %v2822_v48, %v2823_v41  ;;  %v2916_v52 = vunpack.i.h.bf16 %v2914_v38  ;;  %v2408_v62 = vadd.f32 %v5028_v59, %v4763_v49  ;;  %v2926_v15 = vunpack.i.l.bf16 %v2925_v28 }
 0x334   : > { %v5066_v50 = vmax.f32 %v2910_v57, %v2911_v35  ;;  %v2927_v24 = vunpack.i.h.bf16 %v2925_v28  ;;  %v2548_v40 = vmax.f32 %v2398_v8, 0.0  ;;  %v2400_v20 = vadd.f32 %v5013_v10, %v4765_v61 }
 0x335   : > { %v2421_v3 = vpop.f32.mrf.mxu1  ;;  %v2917_v43 = vmax.f32 %v2915_v21, %v2916_v52  ;;  %v2550_v60 = vmax.f32 %v2402_v46, 0.0  ;;  %v2410_v14 = vadd.f32 %v5034_v36, %v4765_v61  ;;  %v2412_v59 = vadd.f32 %v2411_v27, %v4763_v49 }
 0x336   : > { %v2928_v7 = vmax.f32 %v2926_v15, %v2927_v24  ;;  %v2551_v54 = vmax.f32 %v2404_v1, 0.0  ;;  %v2552_v57 = vmax.f32 %v2408_v62, 0.0  ;;  %v2414_v26 = vadd.f32 %v2413_v4, %v4765_v61 }
 0x337   : > { %v2423_v34 = vpop.f32.mrf.mxu1  ;;  %v2918_v44 = vrot.slane %v2917_v43, 4  ;;  %v2554_v35 = vmax.f32 %v2412_v59, 0.0  ;;  %v2418_v38 = vadd.f32 %v2417_v33, %v4763_v49  ;;  %v2420_v8 = vadd.f32 %v2419_v42, %v4765_v61 }
 0x338   : > { %v2929_v41 = vrot.slane %v2928_v7, 4  ;;  %v2549_v28 = vmax.f32 %v2400_v20, 0.0  ;;  %v2553_v46 = vmax.f32 %v2410_v14, 0.0  ;;  %v2555_v21 = vmax.f32 %v2414_v26, 0.0 }
 0x339   : > { %v2427_v5 = vpop.f32.mrf.mxu1  ;;  %v2919_v10 = vmax.f32 %v2917_v43, %v2918_v44  ;;  %v2620_v15 = vpack.c.bf16 %v2550_v60, %v2548_v40  ;;  %v2622_v27 = vpack.c.bf16 %v2554_v35, %v2552_v57  ;;  %v2422_v24 = vadd.f32 %v2421_v3, %v4763_v49 }
 0x33a   : > { %v2930_v36 = vmax.f32 %v2928_v7, %v2929_v41  ;;  %v2621_v62 = vpack.c.bf16 %v2551_v54, %v2549_v28  ;;  %v2623_v58 = vpack.c.bf16 %v2555_v21, %v2553_v46  ;;  %v2424_v4 = vadd.f32 %v2423_v34, %v4765_v61 }
 0x33b   : > { %v2429_v48 = vpop.f32.mrf.mxu1  ;;  %v2920_v1 = vrot.slane %v2919_v10, 2  ;;  %v2936_v12 = vmax.bf16 %v2622_v27, %v2620_v15  ;;  %v2556_v33 = vmax.f32 %v2418_v38, 0.0  ;;  %v2557_v53 = vmax.f32 %v2420_v8, 0.0 }
 0x33c   : > { %v2931_v59 = vrot.slane %v2930_v36, 2  ;;  %v2947_v43 = vmax.bf16 %v2623_v58, %v2621_v62  ;;  %v2428_v20 = vadd.f32 %v2427_v5, %v4763_v49  ;;  %v2430_v14 = vadd.f32 %v2429_v48, %v4765_v61 }
 0x33d   : > { %v2431_v52 = vpop.f32.mrf.mxu1  ;;  %v2921_v42 = vmax.f32 %v2919_v10, %v2920_v1  ;;  %v2937_v60 = vunpack.i.l.bf16 %v2936_v12  ;;  %v2938_v44 = vunpack.i.h.bf16 %v2936_v12  ;;  %v2558_v3 = vmax.f32 %v2422_v24, 0.0 }
 0x33e   : > { %v2932_v40 = vmax.f32 %v2930_v36, %v2931_v59  ;;  %v2948_v54 = vunpack.i.l.bf16 %v2947_v43  ;;  %v2949_v26 = vunpack.i.h.bf16 %v2947_v43  ;;  %v2559_v41 = vmax.f32 %v2424_v4, 0.0 }
 0x33f   : > { %v2433_v7 = vpop.f32.mrf.mxu1  ;;  %v2922_v57 = vrot.slane %v2921_v42, 1  ;;  %v2939_v35 = vmax.f32 %v2937_v60, %v2938_v44  ;;  %v2432_v38 = vadd.f32 %v2431_v52, %v4763_v49  ;;  %v2560_v10 = vmax.f32 %v2428_v20, 0.0 }
 0x340   : > { %v2933_v34 = vrot.slane %v2932_v40, 1  ;;  %v2434_v8 = vadd.f32 %v2433_v7, %v4765_v61  ;;  %v2950_v5 = vmax.f32 %v2948_v54, %v2949_v26  ;;  %v2561_v48 = vmax.f32 %v2430_v14, 0.0 }
 0x341   : > { %v5088_v58 = vmax.f32 %v2921_v42, %v2922_v57  ;;  %v2940_v46 = vrot.slane %v2939_v35, 4  ;;  %v2562_v12 = vmax.f32 %v2432_v38, 0.0  ;;  %v2624_v27 = vpack.c.bf16 %v2558_v3, %v2556_v33 }
 0x342   : > { %v5090_v28 = vmax.f32 %v2932_v40, %v2933_v34  ;;  %v2563_v21 = vmax.f32 %v2434_v8, 0.0  ;;  %v2951_v15 = vrot.slane %v2950_v5, 4  ;;  %v2625_v24 = vpack.c.bf16 %v2559_v41, %v2557_v53 }
 0x343   : > { %v2924_v36 = vpack.i.bf16 %v5088_v58, %v5088_v58  ;;  %v2941_v61 = vmax.f32 %v2939_v35, %v2940_v46  ;;  %v2626_v52 = vpack.c.bf16 %v2562_v12, %v2560_v10 }
 0x344   : > { %v2935_v49 = vpack.i.bf16 %v5090_v28, %v5090_v28  ;;  %v2627_v1 = vpack.c.bf16 %v2563_v21, %v2561_v48  ;;  %v2952_v62 = vmax.f32 %v2950_v5, %v2951_v15 }
 0x345   : > { %v2942_v4 = vrot.slane %v2941_v61, 2  ;;  %v2958_v59 = vmax.bf16 %v2626_v52, %v2624_v27 }
 0x346   : > { %v2969_v42 = vmax.bf16 %v2627_v1, %v2625_v24  ;;  %v2953_v43 = vrot.slane %v2952_v62, 2 }
 0x347   : > { %v2943_v20 = vmax.f32 %v2941_v61, %v2942_v4  ;;  %v2959_v14 = vunpack.i.l.bf16 %v2958_v59  ;;  %v2960_v7 = vunpack.i.h.bf16 %v2958_v59 }
 0x348   : > { %v2970_v40 = vunpack.i.l.bf16 %v2969_v42  ;;  %v2954_v60 = vmax.f32 %v2952_v62, %v2953_v43  ;;  %v2971_v44 = vunpack.i.h.bf16 %v2969_v42 }
 0x349   : > { %v2944_v57 = vrot.slane %v2943_v20, 1  ;;  %v2961_v33 = vmax.f32 %v2959_v14, %v2960_v7 }
 0x34a   : > { %v2955_v53 = vrot.slane %v2954_v60, 1  ;;  %v2972_v3 = vmax.f32 %v2970_v40, %v2971_v44 }
 0x34b   : > { %v5096_v54 = vmax.f32 %v2943_v20, %v2944_v57  ;;  %v2962_v26 = vrot.slane %v2961_v33, 4 }
 0x34c   : > { %v5098_v41 = vmax.f32 %v2954_v60, %v2955_v53  ;;  %v2973_v34 = vrot.slane %v2972_v3, 4 }
 0x34d   : > { %v2946_v35 = vpack.i.bf16 %v5096_v54, %v5096_v54  ;;  %v2963_v38 = vmax.f32 %v2961_v33, %v2962_v26 }
 0x34e   : > { %v2957_v8 = vpack.i.bf16 %v5098_v41, %v5098_v41  ;;  %v2974_v5 = vmax.f32 %v2972_v3, %v2973_v34 }
 0x34f   : > { %v2964_v10 = vrot.slane %v2963_v38, 2 }
 0x350   : > { %v2975_v48 = vrot.slane %v2974_v5, 2 }
 0x351   : > { %v2965_v46 = vmax.f32 %v2963_v38, %v2964_v10 }
 0x352   : > { %v2976_v12 = vmax.f32 %v2974_v5, %v2975_v48 }
 0x353   : > { %v2966_v21 = vrot.slane %v2965_v46, 1 }
 0x354   : > { %v2977_v15 = vrot.slane %v2976_v12, 1  ;;  %2983 = sbr.rel (%p3705_p9) target bundleno = 860 (0x35c), region = 113 }
 0x355   : > { %v5104_v27 = vmax.f32 %v2965_v46, %v2966_v21 }
 0x356   : > { %v5106_v24 = vmax.f32 %v2976_v12, %v2977_v15 }
 0x357   : > { %v2968_v61 = vpack.i.bf16 %v5104_v27, %v5104_v27 }
 0x358   : > { %v2979_v52 = vpack.i.bf16 %v5106_v24, %v5106_v24 }
 0x359   : > { %v4204_v1 = vmov -inf  }
 0x35a   : > { %2984 = vst [vmem:[#allocation2 + $0x10] sm:$0xff] %v4204_v1  ;;  %2985 = vst [vmem:[#allocation2] sm:$0xff] %v4204_v1 }
 0x35b   : > { %2986 = vst [vmem:[#allocation2 + $0x18] sm:$0xff] %v4204_v1  ;;  %2987 = vst [vmem:[#allocation2 + $0x8] sm:$0xff] %v4204_v1 }
 0x35c PF: > { %v5393_v62 = vpack.i.bf16 %v4783_v11, %v4783_v11  ;;  %v5394_v59 = vpack.i.bf16 %v4799_v51, %v4799_v51  ;;  %v5395_v43 = vpack.i.bf16 %v4818_v45, %v4818_v45  ;;  %v5396_v14 = vpack.i.bf16 %v4845_v17, %v4845_v17  ;;  %p3706_p10 = scmp.ne.s32.totalorder %s4193_s23, 1 }
 0x35d   : > { %v5397_v40 = vpack.i.bf16 %v4868_v2, %v4868_v2  ;;  %v5398_v11 = vpack.i.bf16 %v4905_v25, %v4905_v25  ;;  %v5399_v51 = vpack.i.bf16 %v4967_v30, %v4967_v30  ;;  %v5400_v45 = vpack.i.bf16 %v5026_v18, %v5026_v18 }
 0x35e   : > { %v2992_v4 = vunpack.c.l.bf16 %v5393_v62  ;;  %v2994_v42 = vunpack.c.l.bf16 %v5394_v59  ;;  %v2996_v20 = vunpack.c.l.bf16 %v5395_v43  ;;  %v2998_v7 = vunpack.c.l.bf16 %v5396_v14 }
 0x35f   : > { %v3000_v60 = vunpack.c.l.bf16 %v5397_v40  ;;  %v3002_v44 = vunpack.c.l.bf16 %v5398_v11  ;;  %v3004_v57 = vunpack.c.l.bf16 %v5399_v51  ;;  %v3006_v33 = vunpack.c.l.bf16 %v5400_v45 }
 0x360   : > { %vm3056_vm2 = vcmask 1041409   ;;  %vm3058_vm3 = vcmask 1042434   ;;  %vm3060_vm4 = vcmask 1043459   ;;  %vm3062_vm5 = vcmask 1044484  }
 0x361   : > { %v3057_v17 = vsel %vm3056_vm2, %v2994_v42, %v2992_v4  ;;  %vm3064_vm6 = vcmask 1045509   ;;  %vm3066_vm7 = vcmask 1046534   ;;  %v5401_v25 = vpack.i.bf16 %v4789_v6, %v4789_v6  ;;  %v2988_v15 = vld [vmem:[#allocation2 + $0x10] sm:$0xff] }
 0x362   : > { %v3059_v2 = vsel %vm3058_vm3, %v2996_v20, %v3057_v17  ;;  %v5402_v30 = vpack.i.bf16 %v4805_v63, %v4805_v63  ;;  %v5403_v18 = vpack.i.bf16 %v4824_v0, %v4824_v0  ;;  %vm3068_vm8 = vcmask 1047559   ;;  %v5416_v17 = vld [vmem:[#allocation4_spill] sm:$0xff] }
 0x363   : > { %v2993_v53 = vunpack.c.l.bf16 %v5401_v25  ;;  %v3061_v34 = vsel %vm3060_vm4, %v2998_v7, %v3059_v2  ;;  %v5404_v38 = vpack.i.bf16 %v4850_v32, %v4850_v32  ;;  %v5405_v10 = vpack.i.bf16 %v4874_v16, %v4874_v16 }
 0x364   : > { %v2995_v3 = vunpack.c.l.bf16 %v5402_v30  ;;  %v2997_v26 = vunpack.c.l.bf16 %v5403_v18  ;;  %v3063_v48 = vsel %vm3062_vm5, %v3000_v60, %v3061_v34  ;;  %v5406_v63 = vpack.i.bf16 %v4911_v23, %v4911_v23  ;;  %v2989_v60 = vld [vmem:[#allocation2] sm:$0xff]  ;;  %v2990_v34 = vld [vmem:[#allocation2 + $0x18] sm:$0xff] }
 0x365   : > { %v2999_v5 = vunpack.c.l.bf16 %v5404_v38  ;;  %v3001_v6 = vunpack.c.l.bf16 %v5405_v10  ;;  %v5407_v0 = vpack.i.bf16 %v4976_v13, %v4976_v13  ;;  %v3065_v32 = vsel %vm3064_vm6, %v3002_v44, %v3063_v48  ;;  %v2991_v48 = vld [vmem:[#allocation2 + $0x8] sm:$0xff] }
 0x366   : > { %v3003_v46 = vunpack.c.l.bf16 %v5406_v63  ;;  %v3070_v21 = vsel %vm3056_vm2, %v2995_v3, %v2993_v53  ;;  %v3008_v16 = vunpack.c.l.bf16 %v2814_v39  ;;  %v5408_v62 = vpack.i.bf16 %v4886_v22, %v4886_v22 }
 0x367   : > { %v3005_v12 = vunpack.c.l.bf16 %v5407_v0  ;;  %v3071_v1 = vsel %vm3058_vm3, %v2997_v26, %v3070_v21  ;;  %v3067_v4 = vsel %vm3066_vm7, %v3004_v57, %v3065_v32  ;;  %v5409_v13 = vpack.i.bf16 %v5036_v55, %v5036_v55 }
 0x368   : > { %v3010_v23 = vunpack.c.l.bf16 %v5408_v62  ;;  %v3072_v42 = vsel %vm3060_vm4, %v2999_v5, %v3071_v1  ;;  %v5410_v43 = vpack.i.bf16 %v4940_v37, %v4940_v37  ;;  %v3069_v14 = vsel %vm3068_vm8, %v3006_v33, %v3067_v4 }
 0x369   : > { %v3007_v59 = vunpack.c.l.bf16 %v5409_v13  ;;  %v3073_v47 = vsel %vm3062_vm5, %v3001_v6, %v3072_v42  ;;  %v5411_v22 = vpack.i.bf16 %v4997_v56, %v4997_v56  ;;  %v5412_v7 = vpack.i.bf16 %v5052_v19, %v5052_v19 }
 0x36a   : > { %v3012_v20 = vunpack.c.l.bf16 %v5410_v43  ;;  %v3095_v55 = vmax.f32 %v2988_v15, %v3069_v14  ;;  %v3074_v11 = vsel %vm3064_vm6, %v3003_v46, %v3073_v47  ;;  %v3018_v37 = vunpack.c.l.bf16 %v2924_v36 }
 0x36b   : > { %v3014_v39 = vunpack.c.l.bf16 %v5411_v22  ;;  %v3016_v40 = vunpack.c.l.bf16 %v5412_v7  ;;  %v3020_v44 = vunpack.c.l.bf16 %v2946_v35  ;;  %v3075_v51 = vsel %vm3066_vm7, %v3005_v12, %v3074_v11 }
 0x36c   : > { %v3077_v56 = vsel %vm3056_vm2, %v3010_v23, %v3008_v16  ;;  %v5413_v19 = vpack.i.bf16 %v5060_v31, %v5060_v31  ;;  %v5414_v45 = vpack.i.bf16 %v4894_v29, %v4894_v29  ;;  %3099 = vst [vmem:[#allocation2 + $0x10] sm:$0xff] %v3095_v55  ;;  %v3076_v58 = vsel %vm3068_vm8, %v3007_v59, %v3075_v51 }
 0x36d   : > { %v3078_v36 = vsel %vm3058_vm3, %v3012_v20, %v3077_v56  ;;  %v5415_v54 = vpack.i.bf16 %v4948_v9, %v4948_v9  ;;  %v5417_v2 = vpack.i.bf16 %v5416_v17, %v5416_v17  ;;  %v3096_v53 = vmax.f32 %v2989_v60, %v3076_v58 }
 0x36e   : > { %v3009_v57 = vunpack.c.l.bf16 %v5413_v19  ;;  %v3011_v33 = vunpack.c.l.bf16 %v5414_v45  ;;  %v3022_v31 = vunpack.c.l.bf16 %v2968_v61  ;;  %v3079_v29 = vsel %vm3060_vm4, %v3014_v39, %v3078_v36 }
 0x36f   : > { %v3013_v35 = vunpack.c.l.bf16 %v5415_v54  ;;  %v3015_v25 = vunpack.c.l.bf16 %v5417_v2  ;;  %v5418_v30 = vpack.i.bf16 %v5066_v50, %v5066_v50  ;;  %v3080_v18 = vsel %vm3062_vm5, %v3016_v40, %v3079_v29  ;;  %3100 = vst [vmem:[#allocation2] sm:$0xff] %v3096_v53 }
 0x370   : > { %v3019_v9 = vunpack.c.l.bf16 %v2935_v49  ;;  %v3084_v26 = vsel %vm3056_vm2, %v3011_v33, %v3009_v57  ;;  %v3081_v38 = vsel %vm3064_vm6, %v3018_v37, %v3080_v18  ;;  %v3021_v27 = vunpack.c.l.bf16 %v2957_v8 }
 0x371   : > { %v3017_v3 = vunpack.c.l.bf16 %v5418_v30  ;;  %v3085_v61 = vsel %vm3058_vm3, %v3013_v35, %v3084_v26  ;;  %v3082_v50 = vsel %vm3066_vm7, %v3020_v44, %v3081_v38  ;;  %v3023_v5 = vunpack.c.l.bf16 %v2979_v52 }
 0x372   : > { %v3086_v28 = vsel %vm3060_vm4, %v3015_v25, %v3085_v61  ;;  %v3083_v49 = vsel %vm3068_vm8, %v3022_v31, %v3082_v50 }
 0x373   : > { %v3087_v10 = vsel %vm3062_vm5, %v3017_v3, %v3086_v28  ;;  %v3097_v6 = vmax.f32 %v2990_v34, %v3083_v49 }
 0x374   : > { %v3088_v63 = vsel %vm3064_vm6, %v3019_v9, %v3087_v10 }
 0x375   : > { %v3089_v41 = vsel %vm3066_vm7, %v3021_v27, %v3088_v63  ;;  %3101 = vst [vmem:[#allocation2 + $0x18] sm:$0xff] %v3097_v6  ;;  %3106 = sbr.rel (%p3706_p10) target bundleno = 1533 (0x5fd), region = 117 }
 0x376   : > { %v3090_v8 = vsel %vm3068_vm8, %v3023_v5, %v3089_v41 }
 0x377   : > { %v3098_v46 = vmax.f32 %v2991_v48, %v3090_v8 }
 0x379   : > { %3102 = vst [vmem:[#allocation2 + $0x8] sm:$0xff] %v3098_v46 }
 0x37a   : > { %v4127_v24 = vld [vmem:[%s5384_s7 + $0x78] sm:$0xff]   ;;  %v4205_v0 = vmov 0.0   ;;  %v4129_v12 = vld [vmem:[%s5384_s7 + $0x70] sm:$0xff]   ;;  %v4131_v15 = vld [vmem:[%s5384_s7 + $0x68] sm:$0xff]   ;;  %vm4206_vm9 = vmmov 0   ;;  %v4207_v27 = vmov 0  }
 0x37b   : > { %v4128_v52 = vld [vmem:[%s5384_s7 + $0x38] sm:$0xff]   ;;  %3985 = vmatprep.subr.bf16.mxu1 %v4205_v0  ;;  %3816 = vmatprep.subr.bf16.mxu0 %v4127_v24  ;;  %v4130_v21 = vld [vmem:[%s5384_s7 + $0x30] sm:$0xff]   ;;  %v4132_v32 = vld [vmem:[%s5384_s7 + $0x28] sm:$0xff]  }
 0x37c   : > { %3817 = vmatpush3.bf16.msra.mxu0 %v4128_v52  ;;  %v4133_v1 = vld [vmem:[%s5384_s7 + $0x60] sm:$0xff]   ;;  %v4135_v62 = vld [vmem:[%s5384_s7 + $0x58] sm:$0xff]   ;;  %v4137_v4 = vld [vmem:[%s5384_s7 + $0x50] sm:$0xff]   ;;  %4001 = vmatprep.mubr.msk.bf16.mxu1 %vm4206_vm9, %v4205_v0 }
 0x37d   : > { %3818 = vmatprep.subr.bf16.mxu0 %v4129_v12  ;;  %v4134_v16 = vld [vmem:[%s5384_s7 + $0x20] sm:$0xff]   ;;  %v4136_v23 = vld [vmem:[%s5384_s7 + $0x18] sm:$0xff]   ;;  %v4138_v42 = vld [vmem:[%s5384_s7 + $0x10] sm:$0xff]  }
 0x37e   : > { %v3108_v13 = vld [vmem:[#allocation2] sm:$0xff]  ;;  %v4143_v20 = vld [vmem:[%s5386_s9 + $0x38] sm:$0xff]   ;;  %v4139_v14 = vld [vmem:[%s5384_s7 + $0x48] sm:$0xff]  }
 0x37f   : > { %3986 = vmatpush3.bf16.msra.mxu1 %v4143_v20  ;;  %v4144_v47 = vld [vmem:[%s5386_s9 + $0x30] sm:$0xff]   ;;  %v4140_v22 = vld [vmem:[%s5384_s7 + $0x8] sm:$0xff]   ;;  %v4141_v39 = vld [vmem:[%s5384_s7 + $0x40] sm:$0xff]  }
 0x380   : > { %3819 = vmatpush3.bf16.msra.mxu0 %v4130_v21  ;;  %v3110_v59 = vld [vmem:[#allocation2 + $0x8] sm:$0xff]  ;;  %3987 = vmatprep.subr.bf16.mxu1 %v4205_v0  ;;  %v4142_v40 = vld [vmem:[%s5384_s7] sm:$0xff]   ;;  %v3107_v55 = vld [vmem:[#allocation2 + $0x10] sm:$0xff] }
 0x381   : > { %3820 = vmatprep.subr.bf16.mxu0 %v4131_v15  ;;  %v3112_v43 = vpack.c.bf16 %v3110_v59, %v3108_v13  ;;  %v4145_v7 = vld [vmem:[%s5386_s9 + $0x28] sm:$0xff]   ;;  %v3109_v60 = vld [vmem:[#allocation2 + $0x18] sm:$0xff]  ;;  %v4146_v11 = vld [vmem:[%s5386_s9 + $0x20] sm:$0xff]  }
 0x382   : > { %v3111_v37 = vpack.c.bf16 %v3109_v60, %v3107_v55  ;;  %v4147_v44 = vld [vmem:[%s5386_s9 + $0x18] sm:$0xff]   ;;  %v4148_v51 = vld [vmem:[%s5386_s9 + $0x10] sm:$0xff]   ;;  %v4149_v56 = vld [vmem:[%s5386_s9 + $0x8] sm:$0xff]  }
 0x383   : > { %3280 = vmatprep.mubr.bf16.mxu0 %v3112_v43  ;;  %3988 = vmatpush3.bf16.msra.mxu1 %v4144_v47  ;;  %v4150_v19 = vld [vmem:[%s5386_s9] sm:$0xff]   ;;  %v4151_v57 = vld [vmem:[%s5388_s11 + $0x30] ss:$8 sps:$4 sm:$0xff]   ;;  %v4153_v45 = vld [vmem:[%s5388_s11 + $0x34] ss:$8 sps:$4 sm:$0xff]  }
 0x384   : > { %3821 = vmatpush3.bf16.msra.mxu0 %v4132_v32  ;;  %3989 = vmatprep.subr.bf16.mxu1 %v4205_v0  ;;  %v4156_v33 = vld [vmem:[%s5388_s11 + $0x24] ss:$8 sps:$4 sm:$0xff]   ;;  %v4154_v58 = vld [vmem:[%s5388_s11 + $0x20] ss:$8 sps:$4 sm:$0xff]   ;;  %v4159_v9 = vld [vmem:[%s5388_s11 + $0x14] ss:$8 sps:$4 sm:$0xff]  }
 0x385   : > { %3822 = vmatprep.subr.bf16.mxu0 %v4133_v1  ;;  %v3707_v17 = vld [vmem:[%s5385_s8] ss:$0 sm:$0xff]  ;;  %v4157_v26 = vld [vmem:[%s5388_s11 + $0x10] ss:$8 sps:$4 sm:$0xff]   ;;  %v4162_v34 = vld [vmem:[%s5388_s11 + $0x4] ss:$8 sps:$4 sm:$0xff]  }
 0x386   : > { %v4160_v38 = vld [vmem:[%s5388_s11] ss:$8 sps:$4 sm:$0xff]  }
 0x387   : > { %3990 = vmatpush3.bf16.msra.mxu1 %v4145_v7  ;;  %v3724_v61 = vld [vmem:[%s5387_s10] ss:$0 sm:$0xff] }
 0x388   : > { %3823 = vmatpush3.bf16.msra.mxu0 %v4134_v16  ;;  %3991 = vmatprep.subr.bf16.mxu1 %v4205_v0 }
 0x389   : > { %3824 = vmatprep.subr.bf16.mxu0 %v4135_v62 }
 0x38b   : > { %3992 = vmatpush3.bf16.msra.mxu1 %v4146_v11 }
 0x38c   : > { %3825 = vmatpush3.bf16.msra.mxu0 %v4136_v23  ;;  %3993 = vmatprep.subr.bf16.mxu1 %v4205_v0 }
 0x38d   : > { %3826 = vmatprep.subr.bf16.mxu0 %v4137_v4 }
 0x38f   : > { %3994 = vmatpush3.bf16.msra.mxu1 %v4147_v44 }
 0x390   : > { %3827 = vmatpush3.bf16.msra.mxu0 %v4138_v42  ;;  %3995 = vmatprep.subr.bf16.mxu1 %v4205_v0 }
 0x391   : > { %3828 = vmatprep.subr.bf16.mxu0 %v4139_v14 }
 0x393   : > { %3996 = vmatpush3.bf16.msra.mxu1 %v4148_v51 }
 0x394   : > { %3829 = vmatpush3.bf16.msra.mxu0 %v4140_v22  ;;  %3997 = vmatprep.subr.bf16.mxu1 %v4205_v0 }
 0x395   : > { %3830 = vmatprep.subr.bf16.mxu0 %v4141_v39 }
 0x397   : > { %3998 = vmatpush3.bf16.msra.mxu1 %v4149_v56 }
 0x398   : > { %3831 = vmatpush3.bf16.msra.mxu0 %v4142_v40  ;;  %3999 = vmatprep.subr.bf16.mxu1 %v4205_v0 }
 0x399   : > { %3466 = vmatprep.subr.bf16.mxu0 %v4153_v45 }
 0x39b   : > { %3281 = vmatmul.mubr.bf16.vlgmr.msra.gmra.mxu0 %v3111_v37  ;;  %4000 = vmatpush3.bf16.msra.mxu1 %v4150_v19 }
 0x39c   : > { %3467 = vmatpush1.bf16.msra.mxu0 %v4151_v57  ;;  %3490 = vmatprep.mubr.bf16.mxu0 %v4207_v27 }
 0x39d   : > { %3468 = vmatprep.subr.bf16.mxu0 %v4156_v33 }
 0x3a0   : > { %3469 = vmatpush1.bf16.msra.mxu0 %v4154_v58 }
 0x3a1   : > { %3470 = vmatprep.subr.bf16.mxu0 %v4159_v9 }
 0x3a4   : > { %3471 = vmatpush1.bf16.msra.mxu0 %v4157_v26 }
 0x3a5   : > { %3472 = vmatprep.subr.bf16.mxu0 %v4162_v34 }
 0x3a8   : > { %3473 = vmatpush1.bf16.msra.mxu0 %v4160_v38 }
 0x45b   : > { %v3832_v36 = vpop.f32.mrf.mxu0 }
 0x45d   : > { %v3833_v54 = vpop.f32.mrf.mxu0 }
 0x45e   : > { %v3834_v35 = vadd.f32 %v3833_v54, %v3832_v36 }
 0x45f   : > { %v3835_v2 = vpop.f32.mrf.mxu0 }
 0x460   : > { %v3283_v53 = vadd.f32 %v3834_v35, %v3707_v17 }
 0x461   : > { %v3836_v25 = vpop.f32.mrf.mxu0 }
 0x462   : > { %v3837_v31 = vadd.f32 %v3836_v25, %v3835_v2  ;;  %v3289_v30 = vmax.f32 %v3283_v53, 0.0 }
 0x464   : > { %v3286_v29 = vadd.f32 %v3837_v31, %v3707_v17 }
 0x466   : > { %v3290_v3 = vmax.f32 %v3286_v29, 0.0 }
 0x468   : > { %v3291_v18 = vpack.c.bf16 %v3290_v3, %v3289_v30 }
 0x46a   : > { %4002 = vmatmul.mubr.bf16.vlgmr.msra.gmra.mxu1 %v3291_v18 }
 0x52a   : > { %v3397_v50 = vpop.f32.mrf.mxu1 }
 0x52b   : > { %v3398_v28 = vadd.f32 %v3724_v61, %v3397_v50 }
 0x52c   : > { %v4003_v5 = vpop.f32.mrf.mxu1 }
 0x52d   : > { %v3404_v48 = vmax.f32 %v3398_v28, 0.0 }
 0x52e   : > { %v3400_v49 = vpop.f32.mrf.mxu1 }
 0x52f   : > { %v3401_v10 = vadd.f32 %v3724_v61, %v3400_v49 }
 0x530   : > { %v4004_v6 = vpop.f32.mrf.mxu1 }
 0x531   : > { %v3405_v63 = vmax.f32 %v3401_v10, 0.0 }
 0x533   : > { %v3406_v41 = vpack.c.bf16 %v3405_v63, %v3404_v48 }
 0x535   : > { %3741 = vmatmul.mubr.msk.bf16.vlgmr.msra.gmra.mxu0 %vm1493_vm1, %v3406_v41 }
 0x5f5   : > { %v3492_v8 = vpop.f32.mrf.mxu0 }
 0x5f6   : > { %3501 = vst [vmem:[%s5389_s12] sm:$0xff] %v3492_v8 }
 0x5f7   : > { %v3494_v46 = vpop.f32.mrf.mxu0 }
 0x5f8   : > { %3502 = vst [vmem:[%s5389_s12 + $0x8] sm:$0xff] %v3494_v46 }
 0x5f9   : > { %v3496_v24 = vpop.f32.mrf.mxu0 }
 0x5fa   : > { %3503 = vst [vmem:[%s5389_s12 + $0x10] sm:$0xff] %v3496_v24 }
 0x5fb   : > { %v3498_v52 = vpop.f32.mrf.mxu0 }
 0x5fc   : > { %3504 = vst [vmem:[%s5389_s12 + $0x18] sm:$0xff] %v3498_v52 }
 0x5fd PF: > { %s22_s25 = sadd.s32 1, %s4201_s25   ;;  %s5419_s21 = smov %s4189_s22 }
 0x5fe   : > { %p19_p11 = scmp.ge.s32.totalorder %s22_s25, 4   ;;  %s5420_s22 = smov %s4308_s29 }
 0x5ff   : > { %s5421_s23 = smov %s4197_s24  ;;  %s5422_s24 = smov %s5424_s26 }
 0x600   :  { %21 = sbr.rel (!%p19_p11) target bundleno = 3 (0x3), region = 152 }

</bundles_post_ra>
